<compile_context>
chip_gen: v5e
topology: v5e:2x2
jax: 0.10.0
libtpu: 0.0.40
codegen_flags: <defaults>
</compile_context>

<pallas_src>
import functools
import math

import jax
import jax.numpy as jnp
from jax.experimental import pallas as pl
from jax.experimental.pallas import tpu as pltpu


# column indices into the packed (C, 12) per-channel parameter table
(_CONV_B, _LN1_G, _LN1_B, _Q_B, _K_B, _V_B,
 _PROJ_B, _LN2_G, _LN2_B, _FC2_B, _LNF_G, _LNF_B) = range(12)

_GELU_C = math.sqrt(2.0 / math.pi)


def _gelu_tanh(x):
    # matches the module's GELU: 0.5*x*(1+tanh(sqrt(2/pi)*(x+0.044715*x^3)))
    return 0.5 * x * (1.0 + jnp.tanh(_GELU_C * (x + 0.044715 * x * x * x)))


def _layernorm_cf(x, g, b, eps=1e-6):
    # channels-first LayerNorm: x is (C, N), normalized over channels (axis 0); g, b are (C, 1)
    mu = jnp.mean(x, axis=0, keepdims=True)
    var = jnp.mean((x - mu) ** 2, axis=0, keepdims=True)
    return (x - mu) * jax.lax.rsqrt(var + eps) * g + b


def vit_block_kernel(patches_ref, convw_ref, qw_ref, kw_ref, vw_ref,
                     projw_ref, fc1w_ref, fc2w_ref, vecc_ref, fc1b_ref,
                     out_ref, *, num_heads, head_dim):
    H, D = num_heads, head_dim
    C = H * D
    N = out_ref.shape[-1]
    f32 = jnp.float32

    vecc = vecc_ref[...]                       # (C, 12) packed per-channel params

    def col(i):                                # (C, 1) column, broadcasts over tokens (lanes)
        return vecc[:, i:i + 1]

    # -------- PatchEmbed: Conv2d(k=2,s=2) as (C, Kp) @ (Kp, N) --------
    # 2x from `x + img_token_x` and pos_drop (identity at inference) folded host-side.
    p = patches_ref[0]                                                            # (Kp, N)
    x = jnp.dot(convw_ref[...], p, preferred_element_type=f32) + col(_CONV_B)     # (C, N)

    # -------- ViTBlock: attention branch (scale folded into q weight/bias) --------
    h = _layernorm_cf(x, col(_LN1_G), col(_LN1_B))
    q = jnp.dot(qw_ref[...], h, preferred_element_type=f32) + col(_Q_B)           # (C, N)
    k = jnp.dot(kw_ref[...], h, preferred_element_type=f32) + col(_K_B)
    v = jnp.dot(vw_ref[...], h, preferred_element_type=f32) + col(_V_B)

    # head split is a free reshape (D == sublane tile); k / v never leave (H, D, N)
    k_dn = k.reshape(H, D, N)
    v_dn = v.reshape(H, D, N)
    # q takes the single transposed view in the kernel so the score matmul is the
    # canonical batched contraction (lhs last dim x rhs second-to-last, batched over heads).
    q_nd = jnp.swapaxes(q.reshape(H, D, N), 1, 2)                                 # (H, N, D)

    s = jax.lax.dot_general(q_nd, k_dn, (((2,), (1,)), ((0,), (0,))),
                            preferred_element_type=f32)                           # (H, N, N)
    s = s - jnp.max(s, axis=-1, keepdims=True)
    e = jnp.exp(s)
    prob = e * pl.reciprocal(jnp.sum(e, axis=-1, keepdims=True), approx=True)
    # AV product contracts over keys with both operands key-minor (rhs-transposed batched
    # form, same pattern as the flash-attention reference kernel) -> output stays (H, D, N).
    o = jax.lax.dot_general(v_dn, prob, (((2,), (2,)), ((0,), (0,))),
                            preferred_element_type=f32)                           # (H, D, N)

    # fused head-merge + output projection: (H, D, N) -> (C, N) is a free reshape
    o = jnp.dot(projw_ref[...], o.reshape(C, N),
                preferred_element_type=f32) + col(_PROJ_B)
    x = x + o

    # -------- ViTBlock: MLP branch --------
    h2 = _layernorm_cf(x, col(_LN2_G), col(_LN2_B))
    m = jnp.dot(fc1w_ref[...], h2, preferred_element_type=f32) + fc1b_ref[...]    # (M, N)
    m = _gelu_tanh(m)
    m = jnp.dot(fc2w_ref[...], m, preferred_element_type=f32) + col(_FC2_B)       # (C, N)
    x = x + m

    # -------- final LayerNorm; activations already channels-first -> direct store --------
    x = _layernorm_cf(x, col(_LNF_G), col(_LNF_B))
    out_ref[...] = x.reshape(1, C, N)


def _extract_patches_kn(x_nchw, patch_size):
    """NCHW -> (B, Cin*kh*kw, num_patches), patch-vector-major.

    Patch-vector order (cin, kh, kw) matches the Conv2d weight flatten order; token order is
    (fh, fw) row-major, same as the module's flatten(2).transpose(1, 2)."""
    B, Cin, Hh, Ww = x_nchw.shape
    fh, fw = Hh // patch_size, Ww // patch_size
    p = x_nchw.reshape(B, Cin, fh, patch_size, fw, patch_size)
    p = p.transpose(0, 1, 3, 5, 2, 4).reshape(B, Cin * patch_size * patch_size, fh * fw)
    return p, fh, fw


def vit_attention_block(x_nchw, params, *, patch_size=2, num_heads=4):
    B = x_nchw.shape[0]
    f32 = jnp.float32
    patches, fh, fw = _extract_patches_kn(x_nchw.astype(f32), patch_size)  # (B, Kp, N)
    Kp, C = params["conv_w"].shape
    N = fh * fw
    D = C // num_heads
    scale = float(D) ** -0.5
    M = params["fc1_w"].shape[-1]

    qkv_w = params["qkv_w"].astype(f32)
    qkv_b = params["qkv_b"].astype(f32)

    # host-side constant folding + (out, in) pre-transposition of every dense weight:
    # the kernel runs channels-first, so every matmul is canonical and transpose-free.
    conv_wT = (2.0 * params["conv_w"].astype(f32)).T          # (C, Kp)  2x: x + img_token_x
    q_wT = (scale * qkv_w[:, :C]).T                           # (C, C)   attention scale baked in
    k_wT = qkv_w[:, C:2 * C].T
    v_wT = qkv_w[:, 2 * C:].T
    proj_wT = params["proj_w"].astype(f32).T                  # (C, C)
    fc1_wT = params["fc1_w"].astype(f32).T                    # (M, C)
    fc2_wT = params["fc2_w"].astype(f32).T                    # (C, M)

    # packed (C, 12) per-channel parameter table (one resident VMEM tile instead of 12)
    vecc = jnp.stack([
        2.0 * params["conv_b"].astype(f32),
        params["ln1_g"].astype(f32), params["ln1_b"].astype(f32),
        scale * qkv_b[:C], qkv_b[C:2 * C], qkv_b[2 * C:],
        params["proj_b"].astype(f32),
        params["ln2_g"].astype(f32), params["ln2_b"].astype(f32),
        params["fc2_b"].astype(f32),
        params["lnf_g"].astype(f32), params["lnf_b"].astype(f32),
    ], axis=1)
    fc1_b = params["fc1_b"].astype(f32).reshape(M, 1)

    kernel = functools.partial(vit_block_kernel, num_heads=num_heads, head_dim=D)

    def w_spec(shape):        # weights stay VMEM-resident across the batch grid
        return pl.BlockSpec(shape, lambda b: (0, 0))

    out = pl.pallas_call(
        kernel,
        out_shape=jax.ShapeDtypeStruct((B, C, N), f32),
        grid=(B,),
        in_specs=[
            pl.BlockSpec((1, Kp, N), lambda b: (b, 0, 0)),    # per-image im2col patches
            w_spec((C, Kp)), w_spec((C, C)), w_spec((C, C)), w_spec((C, C)),
            w_spec((C, C)), w_spec((M, C)), w_spec((C, M)),
            w_spec((C, 12)), w_spec((M, 1)),
        ],
        out_specs=pl.BlockSpec((1, C, N), lambda b: (b, 0, 0)),
        compiler_params=pltpu.CompilerParams(
            dimension_semantics=("parallel",)),               # images -> both TCs on v7x
    )(patches, conv_wT, q_wT, k_wT, v_wT, proj_wT, fc1_wT, fc2_wT, vecc, fc1_b)

    # channels-first kernel output -> NCHW is a free reshape
    return out.reshape(B, C, fh, fw)


def reference(x_nchw, params, *, patch_size=2, num_heads=4):
    """Pure-JAX reference mirroring the PyTorch forward (eval mode)."""
    patches, fh, fw = _extract_patches_kn(x_nchw, patch_size)
    patches = jnp.swapaxes(patches, 1, 2)                     # (B, N, Kp) token-major
    B, N, _ = patches.shape
    x = patches @ params["conv_w"] + params["conv_b"]
    x = 2.0 * x                      # x + img_token_x (the permute round-trip is an identity)
    C = x.shape[-1]
    hd = C // num_heads
    scale = hd ** -0.5

    def ln(v, g, b):
        mu = jnp.mean(v, axis=-1, keepdims=True)
        var = jnp.mean((v - mu) ** 2, axis=-1, keepdims=True)
        return (v - mu) / jnp.sqrt(var + 1e-6) * g + b

    h = ln(x, params["ln1_g"], params["ln1_b"])
    qkv = h @ params["qkv_w"] + params["qkv_b"]
    qkv = qkv.reshape(B, N, 3, num_heads, hd).transpose(2, 0, 3, 1, 4)
    q, k, v = qkv[0], qkv[1], qkv[2]
    attn = jnp.einsum("bhnd,bhmd->bhnm", q, k) * scale
    attn = jax.nn.softmax(attn, axis=-1)
    o = jnp.einsum("bhnm,bhmd->bhnd", attn, v).transpose(0, 2, 1, 3).reshape(B, N, C)
    o = o @ params["proj_w"] + params["proj_b"]
    x = x + o
    h2 = ln(x, params["ln2_g"], params["ln2_b"])
    m = h2 @ params["fc1_w"] + params["fc1_b"]
    m = _gelu_tanh(m)
    m = m @ params["fc2_w"] + params["fc2_b"]
    x = x + m
    x = ln(x, params["lnf_g"], params["lnf_b"])
    return x.reshape(B, fh, fw, C).transpose(0, 3, 1, 2)


if __name__ == "__main__":
    # small shapes: input_shape=(16,16), patch=2, in_channels=4, num_features=32,
    # heads=4, mlp_ratio=4 -> N=64 tokens, C=32, mlp hidden=128
    B, Cin, H, W = 2, 4, 16, 16
    C, num_heads, mlp_hidden = 32, 4, 128
    Kp = Cin * 2 * 2

    key = jax.random.PRNGKey(0)
    ks = jax.random.split(key, 12)
    x = jax.random.normal(ks[0], (B, Cin, H, W), jnp.float32)

    params = {
        # Conv2d(Cin, C, k=2, s=2) weight, pre-flattened to (Cin*kh*kw, C)
        "conv_w": 0.1 * jax.random.normal(ks[1], (Kp, C), jnp.float32),
        "conv_b": 0.1 * jax.random.normal(ks[2], (C,), jnp.float32),
        "ln1_g": jnp.ones((C,), jnp.float32),
        "ln1_b": jnp.zeros((C,), jnp.float32),
        # Linear weights stored as (in, out)
        "qkv_w": 0.1 * jax.random.normal(ks[3], (C, 3 * C), jnp.float32),
        "qkv_b": 0.1 * jax.random.normal(ks[4], (3 * C,), jnp.float32),
        "proj_w": 0.1 * jax.random.normal(ks[5], (C, C), jnp.float32),
        "proj_b": 0.1 * jax.random.normal(ks[6], (C,), jnp.float32),
        "ln2_g": jnp.ones((C,), jnp.float32),
        "ln2_b": jnp.zeros((C,), jnp.float32),
        "fc1_w": 0.1 * jax.random.normal(ks[7], (C, mlp_hidden), jnp.float32),
        "fc1_b": 0.1 * jax.random.normal(ks[8], (mlp_hidden,), jnp.float32),
        "fc2_w": 0.1 * jax.random.normal(ks[9], (mlp_hidden, C), jnp.float32),
        "fc2_b": 0.1 * jax.random.normal(ks[10], (C,), jnp.float32),
        "lnf_g": jnp.ones((C,), jnp.float32),
        "lnf_b": jnp.zeros((C,), jnp.float32),
    }

    out = vit_attention_block(x, params, patch_size=2, num_heads=num_heads)
    out = jax.block_until_ready(out)
    ref = reference(x, params, patch_size=2, num_heads=num_heads)
    assert out.shape == (B, C, H // 2, W // 2), out.shape
    # tolerance covers the approximate (EUP) softmax reciprocal
    err = float(jnp.max(jnp.abs(out - ref)))
    assert err < 5e-3, err
    print("KERNEL_OK")
</pallas_src>

<mosaic_0001>
module attributes {stable_mosaic.version = 11 : i64} {
  func.func @vit_block_kernel(%arg0: i32, %arg1: memref<1x16x64xf32, #tpu.memory_space<vmem>>, %arg2: memref<32x16xf32, #tpu.memory_space<vmem>>, %arg3: memref<32x32xf32, #tpu.memory_space<vmem>>, %arg4: memref<32x32xf32, #tpu.memory_space<vmem>>, %arg5: memref<32x32xf32, #tpu.memory_space<vmem>>, %arg6: memref<32x32xf32, #tpu.memory_space<vmem>>, %arg7: memref<128x32xf32, #tpu.memory_space<vmem>>, %arg8: memref<32x128xf32, #tpu.memory_space<vmem>>, %arg9: memref<32x12xf32, #tpu.memory_space<vmem>>, %arg10: memref<128x1xf32, #tpu.memory_space<vmem>>, %arg11: memref<1x32x64xf32, #tpu.memory_space<vmem>>) attributes {dimension_semantics = [#tpu.dimension_semantics<parallel>], iteration_bounds = array<i64: 2>, scalar_prefetch = 0 : i64, scratch_operands = 0 : i64, tpu.core_type = #tpu.core_type<tc>, window_params = [{transform_indices = @transform_0, window_bounds = array<i64: 1, 16, 64>}, {pipeline_mode = #tpu.pipeline_mode<synchronous>, transform_indices = @transform_1, window_bounds = array<i64: 32, 16>}, {pipeline_mode = #tpu.pipeline_mode<synchronous>, transform_indices = @transform_2, window_bounds = array<i64: 32, 32>}, {pipeline_mode = #tpu.pipeline_mode<synchronous>, transform_indices = @transform_3, window_bounds = array<i64: 32, 32>}, {pipeline_mode = #tpu.pipeline_mode<synchronous>, transform_indices = @transform_4, window_bounds = array<i64: 32, 32>}, {pipeline_mode = #tpu.pipeline_mode<synchronous>, transform_indices = @transform_5, window_bounds = array<i64: 32, 32>}, {pipeline_mode = #tpu.pipeline_mode<synchronous>, transform_indices = @transform_6, window_bounds = array<i64: 128, 32>}, {pipeline_mode = #tpu.pipeline_mode<synchronous>, transform_indices = @transform_7, window_bounds = array<i64: 32, 128>}, {pipeline_mode = #tpu.pipeline_mode<synchronous>, transform_indices = @transform_8, window_bounds = array<i64: 32, 12>}, {pipeline_mode = #tpu.pipeline_mode<synchronous>, transform_indices = @transform_9, window_bounds = array<i64: 128, 1>}, {transform_indices = @transform_10, window_bounds = array<i64: 1, 32, 64>}]} {
    %c0 = arith.constant 0 : index
    %c0_0 = arith.constant 0 : index
    %0 = vector.load %arg9[%c0, %c0_0] : memref<32x12xf32, #tpu.memory_space<vmem>>, vector<32x12xf32>
    %c0_1 = arith.constant 0 : index
    %c0_2 = arith.constant 0 : index
    %c0_3 = arith.constant 0 : index
    %1 = vector.load %arg1[%c0_1, %c0_2, %c0_3] : memref<1x16x64xf32, #tpu.memory_space<vmem>>, vector<1x16x64xf32>
    %2 = vector.shape_cast %1 : vector<1x16x64xf32> to vector<16x64xf32>
    %c0_4 = arith.constant 0 : index
    %c0_5 = arith.constant 0 : index
    %3 = vector.load %arg2[%c0_4, %c0_5] : memref<32x16xf32, #tpu.memory_space<vmem>>, vector<32x16xf32>
    %cst = arith.constant dense<0.000000e+00> : vector<32x64xf32>
    %4 = tpu.matmul %3, %2, %cst {dimension_numbers = #tpu.dot_dimension_numbers<[1], [0], [0], [1], [0, 0, 1, 1], [], []>} : vector<32x16xf32>, vector<16x64xf32>, vector<32x64xf32> -> vector<32x64xf32>
    %5 = vector.extract_strided_slice %0 {offsets = [0, 0], sizes = [32, 1], strides = [1, 1]} : vector<32x12xf32> to vector<32x1xf32>
    %6 = vector.broadcast %5 : vector<32x1xf32> to vector<32x64xf32>
    %7 = arith.addf %4, %6 : vector<32x64xf32>
    %8 = vector.extract_strided_slice %0 {offsets = [0, 1], sizes = [32, 1], strides = [1, 1]} : vector<32x12xf32> to vector<32x1xf32>
    %9 = vector.extract_strided_slice %0 {offsets = [0, 2], sizes = [32, 1], strides = [1, 1]} : vector<32x12xf32> to vector<32x1xf32>
    %cst_6 = arith.constant dense<0.000000e+00> : vector<64xf32>
    %10 = vector.multi_reduction <add>, %7, %cst_6 [0] : vector<32x64xf32> to vector<64xf32>
    %11 = vector.shape_cast %10 : vector<64xf32> to vector<1x64xf32>
    %cst_7 = arith.constant 3.200000e+01 : f32
    %12 = vector.broadcast %cst_7 : f32 to vector<1x64xf32>
    %13 = arith.divf %11, %12 : vector<1x64xf32>
    %14 = vector.broadcast %13 : vector<1x64xf32> to vector<32x64xf32>
    %15 = arith.subf %7, %14 : vector<32x64xf32>
    %16 = arith.mulf %15, %15 : vector<32x64xf32>
    %cst_8 = arith.constant dense<0.000000e+00> : vector<64xf32>
    %17 = vector.multi_reduction <add>, %16, %cst_8 [0] : vector<32x64xf32> to vector<64xf32>
    %18 = vector.shape_cast %17 : vector<64xf32> to vector<1x64xf32>
    %cst_9 = arith.constant 3.200000e+01 : f32
    %19 = vector.broadcast %cst_9 : f32 to vector<1x64xf32>
    %20 = arith.divf %18, %19 : vector<1x64xf32>
    %21 = vector.broadcast %13 : vector<1x64xf32> to vector<32x64xf32>
    %22 = arith.subf %7, %21 : vector<32x64xf32>
    %cst_10 = arith.constant 9.99999997E-7 : f32
    %23 = vector.broadcast %cst_10 : f32 to vector<1x64xf32>
    %24 = arith.addf %20, %23 : vector<1x64xf32>
    %25 = math.rsqrt %24 : vector<1x64xf32>
    %26 = vector.broadcast %25 : vector<1x64xf32> to vector<32x64xf32>
    %27 = arith.mulf %22, %26 : vector<32x64xf32>
    %28 = vector.broadcast %8 : vector<32x1xf32> to vector<32x64xf32>
    %29 = arith.mulf %27, %28 : vector<32x64xf32>
    %30 = vector.broadcast %9 : vector<32x1xf32> to vector<32x64xf32>
    %31 = arith.addf %29, %30 : vector<32x64xf32>
    %c0_11 = arith.constant 0 : index
    %c0_12 = arith.constant 0 : index
    %32 = vector.load %arg3[%c0_11, %c0_12] : memref<32x32xf32, #tpu.memory_space<vmem>>, vector<32x32xf32>
    %cst_13 = arith.constant dense<0.000000e+00> : vector<32x64xf32>
    %33 = tpu.matmul %32, %31, %cst_13 {dimension_numbers = #tpu.dot_dimension_numbers<[1], [0], [0], [1], [0, 0, 1, 1], [], []>} : vector<32x32xf32>, vector<32x64xf32>, vector<32x64xf32> -> vector<32x64xf32>
    %34 = vector.extract_strided_slice %0 {offsets = [0, 3], sizes = [32, 1], strides = [1, 1]} : vector<32x12xf32> to vector<32x1xf32>
    %35 = vector.broadcast %34 : vector<32x1xf32> to vector<32x64xf32>
    %36 = arith.addf %33, %35 : vector<32x64xf32>
    %c0_14 = arith.constant 0 : index
    %c0_15 = arith.constant 0 : index
    %37 = vector.load %arg4[%c0_14, %c0_15] : memref<32x32xf32, #tpu.memory_space<vmem>>, vector<32x32xf32>
    %cst_16 = arith.constant dense<0.000000e+00> : vector<32x64xf32>
    %38 = tpu.matmul %37, %31, %cst_16 {dimension_numbers = #tpu.dot_dimension_numbers<[1], [0], [0], [1], [0, 0, 1, 1], [], []>} : vector<32x32xf32>, vector<32x64xf32>, vector<32x64xf32> -> vector<32x64xf32>
    %39 = vector.extract_strided_slice %0 {offsets = [0, 4], sizes = [32, 1], strides = [1, 1]} : vector<32x12xf32> to vector<32x1xf32>
    %40 = vector.broadcast %39 : vector<32x1xf32> to vector<32x64xf32>
    %41 = arith.addf %38, %40 : vector<32x64xf32>
    %c0_17 = arith.constant 0 : index
    %c0_18 = arith.constant 0 : index
    %42 = vector.load %arg5[%c0_17, %c0_18] : memref<32x32xf32, #tpu.memory_space<vmem>>, vector<32x32xf32>
    %cst_19 = arith.constant dense<0.000000e+00> : vector<32x64xf32>
    %43 = tpu.matmul %42, %31, %cst_19 {dimension_numbers = #tpu.dot_dimension_numbers<[1], [0], [0], [1], [0, 0, 1, 1], [], []>} : vector<32x32xf32>, vector<32x64xf32>, vector<32x64xf32> -> vector<32x64xf32>
    %44 = vector.extract_strided_slice %0 {offsets = [0, 5], sizes = [32, 1], strides = [1, 1]} : vector<32x12xf32> to vector<32x1xf32>
    %45 = vector.broadcast %44 : vector<32x1xf32> to vector<32x64xf32>
    %46 = arith.addf %43, %45 : vector<32x64xf32>
    %47 = vector.shape_cast %41 : vector<32x64xf32> to vector<4x8x64xf32>
    %48 = vector.shape_cast %46 : vector<32x64xf32> to vector<4x8x64xf32>
    %49 = vector.shape_cast %36 : vector<32x64xf32> to vector<4x8x64xf32>
    %50 = tpu.transpose %49, [0, 2, 1] : vector<4x8x64xf32> -> vector<4x64x8xf32>
    %cst_20 = arith.constant dense<0.000000e+00> : vector<4x64x64xf32>
    %51 = tpu.matmul %50, %47, %cst_20 {dimension_numbers = #tpu.dot_dimension_numbers<[2], [1], [1], [2], [0, 0, 0, 1, 1, 2], [0], [0]>} : vector<4x64x8xf32>, vector<4x8x64xf32>, vector<4x64x64xf32> -> vector<4x64x64xf32>
    %cst_21 = arith.constant dense<0xFF800000> : vector<4x64xf32>
    %52 = vector.multi_reduction <maximumf>, %51, %cst_21 [2] : vector<4x64x64xf32> to vector<4x64xf32>
    %53 = vector.shape_cast %52 : vector<4x64xf32> to vector<4x64x1xf32>
    %54 = vector.broadcast %53 : vector<4x64x1xf32> to vector<4x64x64xf32>
    %55 = arith.subf %51, %54 : vector<4x64x64xf32>
    %56 = math.exp %55 : vector<4x64x64xf32>
    %cst_22 = arith.constant dense<0.000000e+00> : vector<4x64xf32>
    %57 = vector.multi_reduction <add>, %56, %cst_22 [2] : vector<4x64x64xf32> to vector<4x64xf32>
    %58 = vector.shape_cast %57 : vector<4x64xf32> to vector<4x64x1xf32>
    %59 = tpu.reciprocal %58 {approx = true} : vector<4x64x1xf32> -> vector<4x64x1xf32>
    %60 = vector.broadcast %59 : vector<4x64x1xf32> to vector<4x64x64xf32>
    %61 = arith.mulf %56, %60 : vector<4x64x64xf32>
    %cst_23 = arith.constant dense<0.000000e+00> : vector<4x8x64xf32>
    %62 = tpu.matmul %48, %61, %cst_23 {dimension_numbers = #tpu.dot_dimension_numbers<[2], [2], [1], [1], [0, 0, 0, 1, 1, 1], [0], [0]>} : vector<4x8x64xf32>, vector<4x64x64xf32>, vector<4x8x64xf32> -> vector<4x8x64xf32>
    %c0_24 = arith.constant 0 : index
    %c0_25 = arith.constant 0 : index
    %63 = vector.load %arg6[%c0_24, %c0_25] : memref<32x32xf32, #tpu.memory_space<vmem>>, vector<32x32xf32>
    %64 = vector.shape_cast %62 : vector<4x8x64xf32> to vector<32x64xf32>
    %cst_26 = arith.constant dense<0.000000e+00> : vector<32x64xf32>
    %65 = tpu.matmul %63, %64, %cst_26 {dimension_numbers = #tpu.dot_dimension_numbers<[1], [0], [0], [1], [0, 0, 1, 1], [], []>} : vector<32x32xf32>, vector<32x64xf32>, vector<32x64xf32> -> vector<32x64xf32>
    %66 = vector.extract_strided_slice %0 {offsets = [0, 6], sizes = [32, 1], strides = [1, 1]} : vector<32x12xf32> to vector<32x1xf32>
    %67 = vector.broadcast %66 : vector<32x1xf32> to vector<32x64xf32>
    %68 = arith.addf %65, %67 : vector<32x64xf32>
    %69 = arith.addf %7, %68 : vector<32x64xf32>
    %70 = vector.extract_strided_slice %0 {offsets = [0, 7], sizes = [32, 1], strides = [1, 1]} : vector<32x12xf32> to vector<32x1xf32>
    %71 = vector.extract_strided_slice %0 {offsets = [0, 8], sizes = [32, 1], strides = [1, 1]} : vector<32x12xf32> to vector<32x1xf32>
    %cst_27 = arith.constant dense<0.000000e+00> : vector<64xf32>
    %72 = vector.multi_reduction <add>, %69, %cst_27 [0] : vector<32x64xf32> to vector<64xf32>
    %73 = vector.shape_cast %72 : vector<64xf32> to vector<1x64xf32>
    %cst_28 = arith.constant 3.200000e+01 : f32
    %74 = vector.broadcast %cst_28 : f32 to vector<1x64xf32>
    %75 = arith.divf %73, %74 : vector<1x64xf32>
    %76 = vector.broadcast %75 : vector<1x64xf32> to vector<32x64xf32>
    %77 = arith.subf %69, %76 : vector<32x64xf32>
    %78 = arith.mulf %77, %77 : vector<32x64xf32>
    %cst_29 = arith.constant dense<0.000000e+00> : vector<64xf32>
    %79 = vector.multi_reduction <add>, %78, %cst_29 [0] : vector<32x64xf32> to vector<64xf32>
    %80 = vector.shape_cast %79 : vector<64xf32> to vector<1x64xf32>
    %cst_30 = arith.constant 3.200000e+01 : f32
    %81 = vector.broadcast %cst_30 : f32 to vector<1x64xf32>
    %82 = arith.divf %80, %81 : vector<1x64xf32>
    %83 = vector.broadcast %75 : vector<1x64xf32> to vector<32x64xf32>
    %84 = arith.subf %69, %83 : vector<32x64xf32>
    %cst_31 = arith.constant 9.99999997E-7 : f32
    %85 = vector.broadcast %cst_31 : f32 to vector<1x64xf32>
    %86 = arith.addf %82, %85 : vector<1x64xf32>
    %87 = math.rsqrt %86 : vector<1x64xf32>
    %88 = vector.broadcast %87 : vector<1x64xf32> to vector<32x64xf32>
    %89 = arith.mulf %84, %88 : vector<32x64xf32>
    %90 = vector.broadcast %70 : vector<32x1xf32> to vector<32x64xf32>
    %91 = arith.mulf %89, %90 : vector<32x64xf32>
    %92 = vector.broadcast %71 : vector<32x1xf32> to vector<32x64xf32>
    %93 = arith.addf %91, %92 : vector<32x64xf32>
    %c0_32 = arith.constant 0 : index
    %c0_33 = arith.constant 0 : index
    %94 = vector.load %arg7[%c0_32, %c0_33] : memref<128x32xf32, #tpu.memory_space<vmem>>, vector<128x32xf32>
    %cst_34 = arith.constant dense<0.000000e+00> : vector<128x64xf32>
    %95 = tpu.matmul %94, %93, %cst_34 {dimension_numbers = #tpu.dot_dimension_numbers<[1], [0], [0], [1], [0, 0, 1, 1], [], []>} : vector<128x32xf32>, vector<32x64xf32>, vector<128x64xf32> -> vector<128x64xf32>
    %c0_35 = arith.constant 0 : index
    %c0_36 = arith.constant 0 : index
    %96 = vector.load %arg10[%c0_35, %c0_36] : memref<128x1xf32, #tpu.memory_space<vmem>>, vector<128x1xf32>
    %97 = vector.broadcast %96 : vector<128x1xf32> to vector<128x64xf32>
    %98 = arith.addf %95, %97 : vector<128x64xf32>
    %cst_37 = arith.constant 5.000000e-01 : f32
    %99 = vector.broadcast %cst_37 : f32 to vector<128x64xf32>
    %100 = arith.mulf %99, %98 : vector<128x64xf32>
    %cst_38 = arith.constant 4.471500e-02 : f32
    %101 = vector.broadcast %cst_38 : f32 to vector<128x64xf32>
    %102 = arith.mulf %101, %98 : vector<128x64xf32>
    %103 = arith.mulf %102, %98 : vector<128x64xf32>
    %104 = arith.mulf %103, %98 : vector<128x64xf32>
    %105 = arith.addf %98, %104 : vector<128x64xf32>
    %cst_39 = arith.constant 0.797884583 : f32
    %106 = vector.broadcast %cst_39 : f32 to vector<128x64xf32>
    %107 = arith.mulf %106, %105 : vector<128x64xf32>
    %108 = math.tanh %107 : vector<128x64xf32>
    %cst_40 = arith.constant 1.000000e+00 : f32
    %109 = vector.broadcast %cst_40 : f32 to vector<128x64xf32>
    %110 = arith.addf %109, %108 : vector<128x64xf32>
    %111 = arith.mulf %100, %110 : vector<128x64xf32>
    %c0_41 = arith.constant 0 : index
    %c0_42 = arith.constant 0 : index
    %112 = vector.load %arg8[%c0_41, %c0_42] : memref<32x128xf32, #tpu.memory_space<vmem>>, vector<32x128xf32>
    %cst_43 = arith.constant dense<0.000000e+00> : vector<32x64xf32>
    %113 = tpu.matmul %112, %111, %cst_43 {dimension_numbers = #tpu.dot_dimension_numbers<[1], [0], [0], [1], [0, 0, 1, 1], [], []>} : vector<32x128xf32>, vector<128x64xf32>, vector<32x64xf32> -> vector<32x64xf32>
    %114 = vector.extract_strided_slice %0 {offsets = [0, 9], sizes = [32, 1], strides = [1, 1]} : vector<32x12xf32> to vector<32x1xf32>
    %115 = vector.broadcast %114 : vector<32x1xf32> to vector<32x64xf32>
    %116 = arith.addf %113, %115 : vector<32x64xf32>
    %117 = arith.addf %69, %116 : vector<32x64xf32>
    %118 = vector.extract_strided_slice %0 {offsets = [0, 10], sizes = [32, 1], strides = [1, 1]} : vector<32x12xf32> to vector<32x1xf32>
    %119 = vector.extract_strided_slice %0 {offsets = [0, 11], sizes = [32, 1], strides = [1, 1]} : vector<32x12xf32> to vector<32x1xf32>
    %cst_44 = arith.constant dense<0.000000e+00> : vector<64xf32>
    %120 = vector.multi_reduction <add>, %117, %cst_44 [0] : vector<32x64xf32> to vector<64xf32>
    %121 = vector.shape_cast %120 : vector<64xf32> to vector<1x64xf32>
    %cst_45 = arith.constant 3.200000e+01 : f32
    %122 = vector.broadcast %cst_45 : f32 to vector<1x64xf32>
    %123 = arith.divf %121, %122 : vector<1x64xf32>
    %124 = vector.broadcast %123 : vector<1x64xf32> to vector<32x64xf32>
    %125 = arith.subf %117, %124 : vector<32x64xf32>
    %126 = arith.mulf %125, %125 : vector<32x64xf32>
    %cst_46 = arith.constant dense<0.000000e+00> : vector<64xf32>
    %127 = vector.multi_reduction <add>, %126, %cst_46 [0] : vector<32x64xf32> to vector<64xf32>
    %128 = vector.shape_cast %127 : vector<64xf32> to vector<1x64xf32>
    %cst_47 = arith.constant 3.200000e+01 : f32
    %129 = vector.broadcast %cst_47 : f32 to vector<1x64xf32>
    %130 = arith.divf %128, %129 : vector<1x64xf32>
    %131 = vector.broadcast %123 : vector<1x64xf32> to vector<32x64xf32>
    %132 = arith.subf %117, %131 : vector<32x64xf32>
    %cst_48 = arith.constant 9.99999997E-7 : f32
    %133 = vector.broadcast %cst_48 : f32 to vector<1x64xf32>
    %134 = arith.addf %130, %133 : vector<1x64xf32>
    %135 = math.rsqrt %134 : vector<1x64xf32>
    %136 = vector.broadcast %135 : vector<1x64xf32> to vector<32x64xf32>
    %137 = arith.mulf %132, %136 : vector<32x64xf32>
    %138 = vector.broadcast %118 : vector<32x1xf32> to vector<32x64xf32>
    %139 = arith.mulf %137, %138 : vector<32x64xf32>
    %140 = vector.broadcast %119 : vector<32x1xf32> to vector<32x64xf32>
    %141 = arith.addf %139, %140 : vector<32x64xf32>
    %142 = vector.shape_cast %141 : vector<32x64xf32> to vector<1x32x64xf32>
    %c0_49 = arith.constant 0 : index
    %c0_50 = arith.constant 0 : index
    %c0_51 = arith.constant 0 : index
    %143 = vector.load %arg11[%c0_49, %c0_50, %c0_51] : memref<1x32x64xf32, #tpu.memory_space<vmem>>, vector<1x32x64xf32>
    tpu.vector_store %arg11[%c0_49, %c0_50, %c0_51], %142 {strides = array<i32>} : memref<1x32x64xf32, #tpu.memory_space<vmem>>, vector<1x32x64xf32>,
    return
  }
  func.func @transform_0(%arg0: i32) -> (i32, i32, i32) {
    %c0_i32 = arith.constant 0 : i32
    %c0_i32_0 = arith.constant 0 : i32
    %c0_i32_1 = arith.constant 0 : i32
    return %arg0, %c0_i32, %c0_i32_0 : i32, i32, i32
  }
  func.func @transform_1(%arg0: i32) -> (i32, i32) {
    %c0_i32 = arith.constant 0 : i32
    %c0_i32_0 = arith.constant 0 : i32
    %c0_i32_1 = arith.constant 0 : i32
    return %c0_i32, %c0_i32_0 : i32, i32
  }
  func.func @transform_2(%arg0: i32) -> (i32, i32) {
    %c0_i32 = arith.constant 0 : i32
    %c0_i32_0 = arith.constant 0 : i32
    %c0_i32_1 = arith.constant 0 : i32
    return %c0_i32, %c0_i32_0 : i32, i32
  }
  func.func @transform_3(%arg0: i32) -> (i32, i32) {
    %c0_i32 = arith.constant 0 : i32
    %c0_i32_0 = arith.constant 0 : i32
    %c0_i32_1 = arith.constant 0 : i32
    return %c0_i32, %c0_i32_0 : i32, i32
  }
  func.func @transform_4(%arg0: i32) -> (i32, i32) {
    %c0_i32 = arith.constant 0 : i32
    %c0_i32_0 = arith.constant 0 : i32
    %c0_i32_1 = arith.constant 0 : i32
    return %c0_i32, %c0_i32_0 : i32, i32
  }
  func.func @transform_5(%arg0: i32) -> (i32, i32) {
    %c0_i32 = arith.constant 0 : i32
    %c0_i32_0 = arith.constant 0 : i32
    %c0_i32_1 = arith.constant 0 : i32
    return %c0_i32, %c0_i32_0 : i32, i32
  }
  func.func @transform_6(%arg0: i32) -> (i32, i32) {
    %c0_i32 = arith.constant 0 : i32
    %c0_i32_0 = arith.constant 0 : i32
    %c0_i32_1 = arith.constant 0 : i32
    return %c0_i32, %c0_i32_0 : i32, i32
  }
  func.func @transform_7(%arg0: i32) -> (i32, i32) {
    %c0_i32 = arith.constant 0 : i32
    %c0_i32_0 = arith.constant 0 : i32
    %c0_i32_1 = arith.constant 0 : i32
    return %c0_i32, %c0_i32_0 : i32, i32
  }
  func.func @transform_8(%arg0: i32) -> (i32, i32) {
    %c0_i32 = arith.constant 0 : i32
    %c0_i32_0 = arith.constant 0 : i32
    %c0_i32_1 = arith.constant 0 : i32
    return %c0_i32, %c0_i32_0 : i32, i32
  }
  func.func @transform_9(%arg0: i32) -> (i32, i32) {
    %c0_i32 = arith.constant 0 : i32
    %c0_i32_0 = arith.constant 0 : i32
    %c0_i32_1 = arith.constant 0 : i32
    return %c0_i32, %c0_i32_0 : i32, i32
  }
  func.func @transform_10(%arg0: i32) -> (i32, i32, i32) {
    %c0_i32 = arith.constant 0 : i32
    %c0_i32_0 = arith.constant 0 : i32
    %c0_i32_1 = arith.constant 0 : i32
    return %arg0, %c0_i32, %c0_i32_0 : i32, i32, i32
  }
}

</mosaic_0001>

<bundles_post_ra>
// kernel: tpu_custom_call.1
= control target key start
LH: loop header
LB: loop body
LE: loop exit
PB: predicated region body
PF: predicated region fallthrough
CT: control target
= control target key end

     0   :  { %15 = vsyncpa [#allocation3], 0  ;;  %s3949_s0 = inlined_call_operand.vmem [shape: f32[2,16,64], index: 0, kind: input, shape index: {}]   ;;  %s3950_s1 = inlined_call_operand.vmem [shape: f32[32,16], index: 1, kind: input, shape index: {}]   ;;  %s3951_s2 = inlined_call_operand.vmem [shape: f32[32,32], index: 2, kind: input, shape index: {}]   ;;  %s3952_s3 = inlined_call_operand.vmem [shape: f32[32,32], index: 3, kind: input, shape index: {}]   ;;  %s3953_s4 = inlined_call_operand.vmem [shape: f32[32,32], index: 4, kind: input, shape index: {}]   ;;  %s3954_s5 = inlined_call_operand.vmem [shape: f32[32,32], index: 5, kind: input, shape index: {}]   ;;  %s3955_s6 = inlined_call_operand.vmem [shape: f32[128,32], index: 6, kind: input, shape index: {}]   ;;  %s3956_s7 = inlined_call_operand.vmem [shape: f32[32,128], index: 7, kind: input, shape index: {}]   ;;  %s3957_s8 = inlined_call_operand.vmem [shape: f32[32,12], index: 8, kind: input, shape index: {}]   ;;  %s3958_s9 = inlined_call_operand.vmem [shape: f32[128,1], index: 9, kind: input, shape index: {}]   ;;  %s3959_s10 = inlined_call_operand.hbm [shape: f32[2,32,64], index: 10, kind: output, shape index: {}]  }
   0x1   :  { %17 = vsyncpa [#allocation3 + $0x1], 0  ;;  %s2917_s13 = smov 0   ;;  %s2919_s14 = smov 0  }
   0x2   :  { %s2921_s15 = smov 0   ;;  %s2923_s16 = smov 0  }
   0x3 LB: > { %s2938_s17 = sadd.s32 4294967295, %s2845_s16   ;;  %s2393_s18 = sadd.s32 4294967294, %s2845_s16   ;;  %s2845_s16 = sphi %s2923_s16, %s4000_s16   ;;  %s2841_s15 = sphi %s2921_s15, %s3999_s15   ;;  %s2837_s14 = sphi %s2919_s14, %s3998_s14   ;;  %s2833_s13 = sphi %s2917_s13, %s3997_s13  }
   0x4   : > { %s2942_s19 = sadd.s32 1, %s2845_s16   ;;  %s245_s20 = sadd.s32 1, %s2841_s15 }
   0x5   : > { %s242_s21 = ssub.s32 %s2845_s16, %s2942_s19  ;;  %p255_p0 = scmp.ne.s32.totalorder %s2841_s15, %s2837_s14 }
   0x6   : > { %p243_p1 = scmp.eq.s32.totalorder %s242_s21, 0  ;;  %p256_p2 = scmp.eq.s32.totalorder %s2938_s17, 1 }
   0x7   : > { %p261_p3 = scmp.ne.s32.totalorder %s2837_s14, %s2833_s13  ;;  %p262_p4 = scmp.eq.s32.totalorder %s2393_s18, 1 }
   0x8   : > { %s2953_s22 = scalar_select %p243_p1, %s2841_s15, %s245_s20  }
   0x9   : > { %p2955_p5 = por %p256_p2, %p255_p0  ;;  %p2959_p6 = por %p262_p4, %p261_p3 }
   0xa   : > { %p2396_p7 = scmp.ge.s32.totalorder %s2845_s16, 1  ;;  %p315_p8 = scmp.lt.s32.totalorder %s2845_s16, 3 }
   0xc   : > { %p316_p9 = pnand %p2396_p7, %p315_p8 }
   0xe   : > { %319 = sbr.rel (%p316_p9) target bundleno = 2036 (0x7f4), region = 60 }
  0x13   : > { %p353_p10 = scmp.lt.s32.totalorder %s2938_s17, 1  ;;  %v2969_v0 = vld [vmem:[%s3957_s8] sm:$0xff]  ;;  %v3960_v1 = vmov 0   ;;  %v2976_v2 = vld [vmem:[%s3957_s8 + $0x10] sm:$0xff]  ;;  %v2984_v3 = vld [vmem:[%s3957_s8 + $0x18] sm:$0xff]  ;;  %v2848_v4 = vmov 1  }
  0x14   : > { %2574 = vset.pattern.permute.xlu0 %v3960_v1  ;;  %2575 = vset.pattern.permute.xlu1 %v3960_v1  ;;  %v364_v7 = vld [vmem:[%s3950_s1] sm:$0xff]  ;;  %vm388_vm0 = vcmask 130048   ;;  %v2996_v8 = vld [vmem:[%s3957_s8 + $0x8] sm:$0xff]  ;;  %v2849_v10 = vmov 2   ;;  %v366_v11 = vld [vmem:[%s3950_s1 + $0x10] sm:$0xff]  ;;  %v2850_v18 = vmov 32.0  }
  0x15   : > { %s354_s29 = scalar_select %p353_p10, %s2938_s17, 1  ;;  %370 = vperm.xlu0 %2574, %v2969_v0   ;;  %380 = vperm.xlu1 %2575, %v2976_v2   ;;  %v365_v9 = vld [vmem:[%s3950_s1 + $0x8] sm:$0xff]  ;;  %v367_v12 = vld [vmem:[%s3950_s1 + $0x18] sm:$0xff]  ;;  %2607 = vrcp.f32 %v2850_v18  ;;  %vm430_vm1 = vcmask 523264   ;;  %v2851_v61 = vmov 3   ;;  %vm549_vm6 = vcmask 261120  }
  0x16   : > { %2576 = vset.pattern.permute.xlu2 %v2848_v4  ;;  %vm841_vm7 = vcmask 64512   ;;  %s350_s20 = sand.u32 1, %s2837_s14   ;;  %s2510_s25 = sshll.u32 %s2938_s17, 5 }
  0x17   : > { %s2509_s12 = sshll.u32 %s354_s29, 4  ;;  %502 = vperm.xlu2 %2576, %v2984_v3   ;;  %s2327_s28 = scalar_lea.hbm %s3959_s10, %s2510_s25 }
  0x18   : > { %s357_s21 = scalar_lea.vmem %s3949_s0, %s2509_s12  ;;  %s2330_s17 = sshll.u32 %s2327_s28, 4  ;;  %s2331_s17 = int_to_ptr.hbm [resolvable:$true] %s2330_s17 }
  0x19   : > { %v363_v5 = vld [vmem:[%s357_s21 + $0x8] sm:$0xff]  ;;  %v362_v6 = vld [vmem:[%s357_s21] sm:$0xff]  ;;  %s2397_s21 = sshll.u32 %s350_s20, 5  ;;  %s2316_s11 = scalar_lea.sflag [#allocation3], %s350_s20 }
  0x1a   : > { %415 = vmatpush.msra.mxu0 %v363_v5  ;;  %s352_s29 = scalar_lea.vmem [#allocation2], %s2397_s21  ;;  %s2797_s12 = sshra.s32 %s2331_s17, 4  ;;  %s2798_s12 = int_to_ptr.hbm [resolvable:$true] %s2797_s12 }
  0x1b   : > { %v2608_v23 = vpop.eup %2607  ;;  %s2328_s30 = sshll.u32 %s352_s29, 4  ;;  %s2799_s18 = scalar_lea.hbm %s2798_s12, 32  ;;  %s2329_s30 = int_to_ptr.vmem [resolvable:$true] %s2328_s30 }
  0x1c   : > { %416 = vmatpush.msra.mxu0 %v362_v6  ;;  %v445_v27 = vmul.f32 32.0, %v2608_v23  ;;  %vm449_vm2 = vweird.f32 %v2608_v23  ;;  %p2800_p11 = scmp.ne.s32.totalorder %s2798_s12, %s2799_s18  ;;  %s2803_s26 = scalar_lea.hbm %s3959_s10, 64 }
  0x1d   : > { %2400 = vmatmul.msk.f32.vlgmr.msra.gmra.mxu0 %vm388_vm0, %v364_v7  ;;  %375 = vperm.xlu0 %2574, %v2996_v8   ;;  %p2804_p0 = scmp.lt.s32.totalorder %s2798_s12, %s3959_s10  ;;  %p2805_p1 = scmp.lt.s32.totalorder %s2803_s26, %s2799_s18 }
  0x1e   : > { %385 = vperm.xlu1 %2575, %v2984_v3   ;;  %v446_v34 = vsub.f32 1.0, %v445_v27  ;;  %p2801_p12 = pnand %p2800_p11, %p2955_p5 }
  0x1f   : > { %498 = vperm.xlu2 %2576, %v2976_v2   ;;  %p2806_p2 = por %p2805_p1, %p2804_p0 }
  0x20   : > { %v447_v37 = vmul.f32 %v2608_v23, %v446_v34  ;;  %p2802_p13 = pneg %p2801_p12 }
  0x22   : > { %v448_v40 = vadd.f32 %v2608_v23, %v447_v37  ;;  %p2807_p3 = pnand %p2806_p2, %p2802_p13 }
  0x24   : > { %v3036_v43 = vsel %vm449_vm2, %v2608_v23, %v448_v40 }
  0x25   : > { %2401 = vmatmul.msk.f32.gmra.mxu0 %vm388_vm0, %v365_v9  ;;  %2577 = vset.pattern.permute.xlu0 %v2849_v10  ;;  %3982 = vst [vmem:[#allocation9_spill] sm:$0xff] %v3036_v43 }
  0x26   : > { %2578 = vset.pattern.permute.xlu1 %v2848_v4  ;;  %522 = vperm.xlu0 %2577, %v2984_v3  }
  0x27   : > { %494 = vperm.xlu1 %2578, %v2996_v8   ;;  %2579 = vset.pattern.permute.xlu2 %v2849_v10 }
  0x28   : > { %518 = vperm.xlu2 %2579, %v2976_v2  }
  0x2d   : > { %2402 = vmatmul.msk.f32.gmra.mxu0 %vm388_vm0, %v366_v11 }
  0x2e   : > { %510 = vperm.xlu0 %2577, %v2969_v0  }
  0x2f   : > { %490 = vperm.xlu1 %2578, %v2969_v0  }
  0x30   : > { %514 = vperm.xlu2 %2579, %v2996_v8  }
  0x35   : > { %2403 = vmatmul.msk.f32.gmra.mxu0 %vm388_vm0, %v367_v12  ;;  %v2852_v12 = vmov 4  }
  0x37   : > { %2580 = vset.pattern.permute.xlu1 %v2851_v61 }
  0x38   : > { %538 = vperm.xlu1 %2580, %v2996_v8   ;;  %2581 = vset.pattern.permute.xlu2 %v2852_v12 }
  0x39   : > { %600 = vperm.xlu2 %2581, %v2996_v8  }
  0x40   : > { %546 = vperm.xlu1 %2580, %v2984_v3  }
  0x41   : > { %2582 = vset.pattern.permute.xlu2 %v2851_v61 }
  0x42   : > { %542 = vperm.xlu2 %2582, %v2976_v2  }
  0x48   : > { %2583 = vset.pattern.permute.xlu1 %v2852_v12 }
  0x49   : > { %608 = vperm.xlu1 %2583, %v2984_v3  }
  0x4a   : > { %2584 = vset.pattern.permute.xlu2 %v2852_v12 }
  0x4b   : > { %604 = vperm.xlu2 %2584, %v2976_v2   ;;  %v529_v2 = vld [vmem:[%s3951_s2] sm:$0xff] }
  0x51   : > { %2585 = vset.pattern.permute.xlu1 %v2851_v61 }
  0x52   : > { %534 = vperm.xlu1 %2585, %v2969_v0  }
  0x53   : > { %596 = vperm.xlu2 %2584, %v2969_v0   ;;  %v593_v0 = vld [vmem:[%s3952_s3 + $0x10] sm:$0xff] }
  0x71   : > { %v503_v9 = vpop.permute.xlu2 %502 }
  0x87   : > { %v371_v14 = vpop.permute.xlu0 %370  ;;  %v381_v16 = vpop.permute.xlu1 %380 }
  0x8f   : > { %v376_v17 = vpop.permute.xlu0 %375 }
  0x90   : > { %v386_v29 = vpop.permute.xlu1 %385 }
  0x98   : > { %v523_v8 = vpop.permute.xlu0 %522 }
  0x9a   : > { %v418_v13 = vpop.f32.mrf.mxu0 }
  0x9b   : > { %v3022_v21 = vadd.f32 %v418_v13, %v371_v14  ;;  %v499_v13 = vpop.permute.xlu2 %498 }
  0x9d   : > { %3979 = vst [vmem:[#allocation6_spill] sm:$0xff] %v3022_v21  ;;  %v431_v25 = vsel %vm430_vm1, %v3022_v21, 0.0 }
  0xa2   : > { %v421_v15 = vpop.f32.mrf.mxu0 }
  0xa3   : > { %v3020_v20 = vadd.f32 %v421_v15, %v376_v17 }
  0xa5   : > { %3978 = vst [vmem:[#allocation5_spill] sm:$0xff] %v3020_v20  ;;  %v432_v24 = vsel %vm430_vm1, %v3020_v20, 0.0 }
  0xa6   : > { %v433_v28 = vadd.f32 %v432_v24, %v431_v25  ;;  %v519_v24 = vpop.permute.xlu2 %518 }
  0xaa   : > { %v424_v19 = vpop.f32.mrf.mxu0 }
  0xab   : > { %v3024_v22 = vadd.f32 %v424_v19, %v381_v16  ;;  %v495_v19 = vpop.permute.xlu1 %494 }
  0xad   : > { %3980 = vst [vmem:[#allocation7_spill] sm:$0xff] %v3024_v22  ;;  %v434_v26 = vsel %vm430_vm1, %v3024_v22, 0.0 }
  0xae   : > { %v435_v32 = vadd.f32 %v434_v26, %v433_v28  ;;  %v515_v37 = vpop.permute.xlu2 %514 }
  0xb2   : > { %v427_v30 = vpop.f32.mrf.mxu0 }
  0xb3   : > { %v3032_v31 = vadd.f32 %v427_v30, %v386_v29  ;;  %v491_v34 = vpop.permute.xlu1 %490 }
  0xb5   : > { %3981 = vst [vmem:[#allocation8_spill] sm:$0xff] %v3032_v31  ;;  %v436_v33 = vsel %vm430_vm1, %v3032_v31, 0.0 }
  0xb6   : > { %v437_v35 = vadd.f32 %v436_v33, %v435_v32 }
  0xb8   : > { %v438_v36 = vrot.slane %v437_v35, 4 }
  0xba   : > { %v439_v38 = vadd.f32 %v438_v36, %v437_v35 }
  0xbc   : > { %v440_v39 = vrot.slane %v439_v38, 2 }
  0xbe   : > { %v441_v41 = vadd.f32 %v440_v39, %v439_v38  ;;  %v511_v39 = vpop.permute.xlu0 %510 }
  0xc0   : > { %v442_v42 = vrot.slane %v441_v41, 1 }
  0xc2   : > { %v443_v44 = vadd.f32 %v442_v42, %v441_v41  ;;  %v591_v41 = vld [vmem:[%s3952_s3] sm:$0xff]  ;;  %v530_v42 = vld [vmem:[%s3951_s2 + $0x8] sm:$0xff] }
  0xc4   : > { %v451_v45 = vmul.f32 %v3036_v43, %v443_v44  ;;  %v592_v44 = vld [vmem:[%s3952_s3 + $0x8] sm:$0xff] }
  0xc6   : > { %v452_v46 = vsub.f32 %v3022_v21, %v451_v45  ;;  %v453_v47 = vsub.f32 %v3020_v20, %v451_v45  ;;  %v454_v48 = vsub.f32 %v3024_v22, %v451_v45  ;;  %v455_v49 = vsub.f32 %v3032_v31, %v451_v45  ;;  %v531_v45 = vld [vmem:[%s3951_s2 + $0x10] sm:$0xff] }
  0xc8   : > { %v456_v50 = vmul.f32 %v452_v46, %v452_v46  ;;  %v457_v51 = vmul.f32 %v453_v47, %v453_v47  ;;  %v458_v52 = vmul.f32 %v454_v48, %v454_v48  ;;  %v459_v53 = vmul.f32 %v455_v49, %v455_v49 }
  0xca   : > { %v460_v54 = vsel %vm430_vm1, %v456_v50, 0.0  ;;  %v461_v55 = vsel %vm430_vm1, %v457_v51, 0.0  ;;  %v463_v57 = vsel %vm430_vm1, %v458_v52, 0.0  ;;  %v465_v59 = vsel %vm430_vm1, %v459_v53, 0.0  ;;  %v539_v51 = vpop.permute.xlu1 %538 }
  0xcb   : > { %v462_v56 = vadd.f32 %v461_v55, %v460_v54  ;;  %v601_v54 = vpop.permute.xlu2 %600 }
  0xcd   : > { %v464_v58 = vadd.f32 %v463_v57, %v462_v56 }
  0xcf   : > { %v466_v60 = vadd.f32 %v465_v59, %v464_v58 }
  0xd1   : > { %v467_v62 = vrot.slane %v466_v60, 4 }
  0xd2   : > { %v547_v58 = vpop.permute.xlu1 %546 }
  0xd3   : > { %v468_v63 = vadd.f32 %v467_v62, %v466_v60 }
  0xd5   : > { %v469_v4 = vrot.slane %v468_v63, 2 }
  0xd7   : > { %v470_v5 = vadd.f32 %v469_v4, %v468_v63 }
  0xd9   : > { %v471_v6 = vrot.slane %v470_v5, 1 }
  0xda   : > { %v609_v62 = vpop.permute.xlu1 %608 }
  0xdb   : > { %v472_v7 = vadd.f32 %v471_v6, %v470_v5  ;;  %v543_v5 = vpop.permute.xlu2 %542  ;;  %v654_v6 = vld [vmem:[%s3953_s4 + $0x10] sm:$0xff] }
  0xdd   : > { %v473_v10 = vmul.f32 %v472_v7, %v3036_v43 }
  0xdf   : > { %v474_v11 = vadd.f32 1e-06, %v473_v10 }
  0xe1   : > { %2609 = vrsqrt.f32 %v474_v11  ;;  %vm481_vm4 = vweird.f32 %v474_v11 }
  0xe3   : > { %v605_v10 = vpop.permute.xlu2 %604 }
  0xe7   : > { %v2610_v14 = vpop.eup %2609 }
  0xe8   : > { %v476_v15 = vmul.f32 %v2610_v14, %v474_v11  ;;  %vm482_vm3 = vweird.f32 %v2610_v14 }
  0xe9   : > { %vm483_vm5 = vmor %vm481_vm4, %vm482_vm3 }
  0xea   : > { %v477_v16 = vmul.f32 %v2610_v14, %v476_v15 }
  0xeb   : > { %v597_v12 = vpop.permute.xlu2 %596 }
  0xec   : > { %v478_v17 = vmul.f32 0.5, %v477_v16 }
  0xee   : > { %v479_v18 = vsub.f32 1.5, %v478_v17 }
  0xf0   : > { %v480_v23 = vmul.f32 %v2610_v14, %v479_v18 }
  0xf2   : > { %v484_v3 = vsel %vm483_vm5, %v2610_v14, %v480_v23  ;;  %v535_v14 = vpop.permute.xlu1 %534  ;;  %v652_v23 = vld [vmem:[%s3953_s4] sm:$0xff] }
  0xf3   : > { %v488_v25 = vmul.f32 %v484_v3, %v455_v49  ;;  %v487_v26 = vmul.f32 %v484_v3, %v454_v48  ;;  %v486_v27 = vmul.f32 %v484_v3, %v453_v47  ;;  %v485_v30 = vmul.f32 %v484_v3, %v452_v46  ;;  %v532_v46 = vld [vmem:[%s3951_s2 + $0x18] sm:$0xff]  ;;  %v653_v48 = vld [vmem:[%s3953_s4 + $0x8] sm:$0xff] }
  0xf4   : > { %v594_v47 = vld [vmem:[%s3952_s3 + $0x18] sm:$0xff] }
  0xf5   : > { %v508_v28 = vmul.f32 %v503_v9, %v488_v25  ;;  %v507_v29 = vmul.f32 %v499_v13, %v487_v26  ;;  %v506_v32 = vmul.f32 %v495_v19, %v486_v27  ;;  %v505_v36 = vmul.f32 %v491_v34, %v485_v30  ;;  %v655_v9 = vld [vmem:[%s3953_s4 + $0x18] sm:$0xff] }
  0xf7   : > { %v528_v33 = vadd.f32 %v523_v8, %v508_v28  ;;  %v527_v35 = vadd.f32 %v519_v24, %v507_v29  ;;  %v526_v38 = vadd.f32 %v515_v37, %v506_v32  ;;  %v525_v40 = vadd.f32 %v511_v39, %v505_v36 }
  0xf9   : > { %574 = vmatpush.msra.mxu1 %v528_v33  ;;  %635 = vmatpush.msra.mxu2 %v528_v33 }
  0xfa   : > { %696 = vmatpush.msrb.mxu0 %v528_v33  ;;  %2511 = vmatpush.msra.mxu3 %v528_v33 }
  0xfb   : > { %575 = vmatpush.msra.mxu1 %v527_v35  ;;  %636 = vmatpush.msra.mxu2 %v527_v35 }
  0xfc   : > { %697 = vmatpush.msrb.mxu0 %v527_v35  ;;  %2512 = vmatpush.msra.mxu3 %v527_v35 }
  0xfd   : > { %576 = vmatpush.msra.mxu1 %v526_v38  ;;  %637 = vmatpush.msra.mxu2 %v526_v38 }
  0xfe   : > { %698 = vmatpush.msrb.mxu0 %v526_v38  ;;  %2513 = vmatpush.msra.mxu3 %v526_v38 }
  0xff   : > { %577 = vmatpush.msra.mxu1 %v525_v40  ;;  %638 = vmatpush.msra.mxu2 %v525_v40 }
 0x100   : > { %699 = vmatpush.msrb.mxu0 %v525_v40  ;;  %2514 = vmatpush.msra.mxu3 %v525_v40 }
 0x101   : > { %2404 = vmatmul.msk.f32.vlgmr.msra.gmra.mxu1 %vm549_vm6, %v529_v2  ;;  %2408 = vmatmul.msk.f32.vlgmr.msra.gmra.mxu2 %vm549_vm6, %v591_v41 }
 0x102   : > { %2413 = vmatmul.msk.f32.vlgmr.msra.gmra.mxu3 %vm549_vm6, %v653_v48  ;;  %2412 = vmatmul.msk.f32.vlgmr.msrb.gmra.mxu0 %vm549_vm6, %v652_v23 }
 0x109   : > { %2405 = vmatmul.msk.f32.gmra.mxu1 %vm549_vm6, %v530_v42  ;;  %2409 = vmatmul.msk.f32.gmra.mxu2 %vm549_vm6, %v592_v44 }
 0x10a   : > { %2414 = vmatmul.msk.f32.gmra.mxu3 %vm549_vm6, %v654_v6 }
 0x111   : > { %2406 = vmatmul.msk.f32.gmra.mxu1 %vm549_vm6, %v531_v45  ;;  %2410 = vmatmul.msk.f32.gmra.mxu2 %vm549_vm6, %v593_v0 }
 0x112   : > { %2415 = vmatmul.msk.f32.gmra.mxu3 %vm549_vm6, %v655_v9 }
 0x119   : > { %2407 = vmatmul.msk.f32.gmra.mxu1 %vm549_vm6, %v532_v46  ;;  %2411 = vmatmul.msk.f32.gmra.mxu2 %vm549_vm6, %v594_v47 }
 0x17e   : > { %v579_v49 = vpop.f32.mrf.mxu1 }
 0x17f   : > { %v580_v15 = vadd.f32 %v579_v49, %v535_v14 }
 0x184   : > { %v640_v50 = vpop.f32.mrf.mxu2 }
 0x185   : > { %v641_v13 = vadd.f32 %v640_v50, %v597_v12  ;;  %v3129_v45 = vpop.f32.mrf.mxu3 }
 0x186   : > { %v582_v52 = vpop.f32.mrf.mxu1 }
 0x187   : > { %v583_v53 = vadd.f32 %v582_v52, %v539_v51  ;;  %881 = vmatpush.msra.mxu0 %v641_v13 }
 0x189   : > { %745 = vxpose.xlu0.b32.start.end [1/1] (short) (narrow) %v583_v53, 64 }
 0x18c   : > { %v643_v55 = vpop.f32.mrf.mxu2 }
 0x18d   : > { %v644_v56 = vadd.f32 %v643_v55, %v601_v54  ;;  %v3134_v49 = vpop.f32.mrf.mxu3 }
 0x18e   : > { %v585_v57 = vpop.f32.mrf.mxu1 }
 0x18f   : > { %946 = vmatpush.msrb.mxu3 %v644_v56  ;;  %v586_v7 = vadd.f32 %v585_v57, %v543_v5 }
 0x191   : > { %777 = vxpose.xlu2.b32.start.end [1/1] (short) (narrow) %v586_v7, 64 }
 0x194   : > { %v646_v59 = vpop.f32.mrf.mxu2 }
 0x195   : > { %v647_v11 = vadd.f32 %v646_v59, %v605_v10  ;;  %v3140_v52 = vpop.f32.mrf.mxu3 }
 0x196   : > { %v588_v60 = vpop.f32.mrf.mxu1 }
 0x197   : > { %v589_v61 = vadd.f32 %v588_v60, %v547_v58  ;;  %1011 = vmatpush.msrb.mxu2 %v647_v11 }
 0x199   : > { %809 = vxpose.xlu1.b32.start.end [1/1] (short) (narrow) %v589_v61, 64  ;;  %v3158_v61 = vpop.f32.mrf.mxu0 }
 0x19c   : > { %v649_v63 = vpop.f32.mrf.mxu2 }
 0x19d   : > { %v650_v4 = vadd.f32 %v649_v63, %v609_v62 }
 0x19f   : > { %1076 = vmatpush.msra.mxu3 %v650_v4 }
 0x1c9   : > { %713 = vxpose.xlu0.b32.start.end [1/1] (short) (narrow) %v580_v15, 64 }
 0x22a   : > { %v793_v3 = vpop.trf.xlu2 }
 0x22b   : > { %2432 = vmatmul.msk.f32.vlgmr.msrb.gmra.mxu2 %vm841_vm7, %v793_v3 }
 0x22d   : > { %v761_v16 = vpop.trf.xlu0 }
 0x22e   : > { %2424 = vmatmul.msk.f32.vlgmr.msrb.gmra.mxu3 %vm841_vm7, %v761_v16 }
 0x232   : > { %v794_v25 = vpop.trf.xlu2 }
 0x233   : > { %2433 = vmatmul.msk.f32.gmra.mxu2 %vm841_vm7, %v794_v25 }
 0x235   : > { %v762_v17 = vpop.trf.xlu0 }
 0x236   : > { %2425 = vmatmul.msk.f32.gmra.mxu3 %vm841_vm7, %v762_v17 }
 0x23a   : > { %v795_v27 = vpop.trf.xlu2 }
 0x23b   : > { %2434 = vmatmul.msk.f32.gmra.mxu2 %vm841_vm7, %v795_v27 }
 0x23d   : > { %v763_v18 = vpop.trf.xlu0  ;;  %v825_v28 = vpop.trf.xlu1 }
 0x23e   : > { %2426 = vmatmul.msk.f32.gmra.mxu3 %vm841_vm7, %v763_v18 }
 0x242   : > { %v796_v30 = vpop.trf.xlu2 }
 0x243   : > { %2435 = vmatmul.msk.f32.gmra.mxu2 %vm841_vm7, %v796_v30 }
 0x245   : > { %v764_v19 = vpop.trf.xlu0  ;;  %v826_v32 = vpop.trf.xlu1 }
 0x246   : > { %2427 = vmatmul.msk.f32.gmra.mxu3 %vm841_vm7, %v764_v19 }
 0x24a   : > { %v797_v36 = vpop.trf.xlu2 }
 0x24b   : > { %2436 = vmatmul.msk.f32.gmra.mxu2 %vm841_vm7, %v797_v36 }
 0x24d   : > { %v765_v24 = vpop.trf.xlu0  ;;  %v827_v34 = vpop.trf.xlu1 }
 0x24e   : > { %2428 = vmatmul.msk.f32.gmra.mxu3 %vm841_vm7, %v765_v24 }
 0x252   : > { %v798_v39 = vpop.trf.xlu2 }
 0x253   : > { %2437 = vmatmul.msk.f32.gmra.mxu2 %vm841_vm7, %v798_v39 }
 0x255   : > { %v766_v8 = vpop.trf.xlu0  ;;  %v828_v38 = vpop.trf.xlu1 }
 0x256   : > { %2429 = vmatmul.msk.f32.gmra.mxu3 %vm841_vm7, %v766_v8 }
 0x25a   : > { %v799_v2 = vpop.trf.xlu2 }
 0x25b   : > { %2438 = vmatmul.msk.f32.gmra.mxu2 %vm841_vm7, %v799_v2 }
 0x25d   : > { %v767_v26 = vpop.trf.xlu0  ;;  %v829_v41 = vpop.trf.xlu1 }
 0x25e   : > { %2430 = vmatmul.msk.f32.gmra.mxu3 %vm841_vm7, %v767_v26 }
 0x262   : > { %v800_v46 = vpop.trf.xlu2 }
 0x263   : > { %2439 = vmatmul.msk.f32.gmra.mxu2 %vm841_vm7, %v800_v46 }
 0x265   : > { %v768_v29 = vpop.trf.xlu0  ;;  %v830_v44 = vpop.trf.xlu1 }
 0x266   : > { %2431 = vmatmul.msk.f32.gmra.mxu3 %vm841_vm7, %v768_v29 }
 0x26d   : > { %v729_v33 = vpop.trf.xlu0  ;;  %v831_v47 = vpop.trf.xlu1 }
 0x26e   : > { %2416 = vmatmul.msk.f32.vlgmr.msra.gmra.mxu0 %vm841_vm7, %v729_v33  ;;  %2440 = vmatmul.msk.f32.vlgmr.msra.gmra.mxu3 %vm841_vm7, %v825_v28 }
 0x275   : > { %v730_v35 = vpop.trf.xlu0  ;;  %v832_v50 = vpop.trf.xlu1 }
 0x276   : > { %2417 = vmatmul.msk.f32.gmra.mxu0 %vm841_vm7, %v730_v35  ;;  %2441 = vmatmul.msk.f32.gmra.mxu3 %vm841_vm7, %v826_v32 }
 0x27d   : > { %v731_v37 = vpop.trf.xlu0 }
 0x27e   : > { %2418 = vmatmul.msk.f32.gmra.mxu0 %vm841_vm7, %v731_v37  ;;  %2442 = vmatmul.msk.f32.gmra.mxu3 %vm841_vm7, %v827_v34 }
 0x285   : > { %v732_v40 = vpop.trf.xlu0 }
 0x286   : > { %2419 = vmatmul.msk.f32.gmra.mxu0 %vm841_vm7, %v732_v40  ;;  %2443 = vmatmul.msk.f32.gmra.mxu3 %vm841_vm7, %v828_v38 }
 0x28d   : > { %v733_v42 = vpop.trf.xlu0 }
 0x28e   : > { %2420 = vmatmul.msk.f32.gmra.mxu0 %vm841_vm7, %v733_v42  ;;  %2444 = vmatmul.msk.f32.gmra.mxu3 %vm841_vm7, %v829_v41 }
 0x295   : > { %v734_v0 = vpop.trf.xlu0 }
 0x296   : > { %2421 = vmatmul.msk.f32.gmra.mxu0 %vm841_vm7, %v734_v0  ;;  %2445 = vmatmul.msk.f32.gmra.mxu3 %vm841_vm7, %v830_v44 }
 0x29d   : > { %v735_v48 = vpop.trf.xlu0 }
 0x29e   : > { %2422 = vmatmul.msk.f32.gmra.mxu0 %vm841_vm7, %v735_v48  ;;  %2446 = vmatmul.msk.f32.gmra.mxu3 %vm841_vm7, %v831_v47 }
 0x2a5   : > { %v736_v51 = vpop.trf.xlu0 }
 0x2a6   : > { %2423 = vmatmul.msk.f32.gmra.mxu0 %vm841_vm7, %v736_v51  ;;  %2447 = vmatmul.msk.f32.gmra.mxu3 %vm841_vm7, %v832_v50 }
 0x2ae   : > { %v3162_v63 = vpop.f32.mrf.mxu2 }
 0x2af   : > { %v1150_v15 = vsel %vm430_vm1, %v3162_v63, -inf }
 0x2b1   : > { %v3142_v53 = vpop.f32.mrf.mxu3 }
 0x2b2   : > { %v1126_v54 = vsel %vm430_vm1, %v3142_v53, -inf }
 0x2b3   : > { %1127 = vmax.xlane.f32.xlu2 %v1126_v54 }
 0x2b6   : > { %v3172_v9 = vpop.f32.mrf.mxu2 }
 0x2b7   : > { %v1153_v13 = vsel %vm430_vm1, %v3172_v9, -inf }
 0x2b9   : > { %v3146_v55 = vpop.f32.mrf.mxu3 }
 0x2ba   : > { %v1129_v10 = vsel %vm430_vm1, %v3146_v55, -inf }
 0x2be   : > { %v3188_v17 = vpop.f32.mrf.mxu2 }
 0x2bf   : > { %v1156_v23 = vsel %vm430_vm1, %v3188_v17, -inf }
 0x2c1   : > { %v3148_v56 = vpop.f32.mrf.mxu3 }
 0x2c2   : > { %v1132_v24 = vsel %vm430_vm1, %v3148_v56, -inf }
 0x2c6   : > { %v3200_v8 = vpop.f32.mrf.mxu2 }
 0x2c7   : > { %v1159_v26 = vsel %vm430_vm1, %v3200_v8, -inf }
 0x2c9   : > { %v3150_v57 = vpop.f32.mrf.mxu3 }
 0x2ca   : > { %v1135_v29 = vsel %vm430_vm1, %v3150_v57, -inf }
 0x2ce   : > { %v3222_v36 = vpop.f32.mrf.mxu2 }
 0x2cf   : > { %v1162_v40 = vsel %vm430_vm1, %v3222_v36, -inf }
 0x2d1   : > { %v3152_v58 = vpop.f32.mrf.mxu3 }
 0x2d2   : > { %v1138_v33 = vsel %vm430_vm1, %v3152_v58, -inf }
 0x2d6   : > { %v3234_v41 = vpop.f32.mrf.mxu2 }
 0x2d7   : > { %v1165_v46 = vsel %vm430_vm1, %v3234_v41, -inf }
 0x2d9   : > { %v3154_v59 = vpop.f32.mrf.mxu3 }
 0x2da   : > { %v1141_v34 = vsel %vm430_vm1, %v3154_v59, -inf }
 0x2de   : > { %v3250_v51 = vpop.f32.mrf.mxu2 }
 0x2df   : > { %v1168_v54 = vsel %vm430_vm1, %v3250_v51, -inf }
 0x2e1   : > { %v3156_v60 = vpop.f32.mrf.mxu3 }
 0x2e2   : > { %v1144_v48 = vsel %vm430_vm1, %v3156_v60, -inf }
 0x2e9   : > { %v3160_v62 = vpop.f32.mrf.mxu3 }
 0x2eb   : > { %v3164_v4 = vpop.f32.mrf.mxu0 }
 0x2ec   : > { %v1102_v5 = vsel %vm430_vm1, %v3164_v4, -inf }
 0x2ed   : > { %1103 = vmax.xlane.f32.xlu0 %v1102_v5 }
 0x2f1   : > { %v3168_v6 = vpop.f32.mrf.mxu3 }
 0x2f2   : > { %v1174_v50 = vsel %vm430_vm1, %v3168_v6, -inf }
 0x2f3   : > { %v3170_v7 = vpop.f32.mrf.mxu0 }
 0x2f4   : > { %v1105_v11 = vsel %vm430_vm1, %v3170_v7, -inf }
 0x2f5   : > { %1130 = vmax.xlane.f32.xlu0 %v1129_v10  ;;  %1106 = vmax.xlane.f32.xlu1 %v1105_v11  ;;  %v1147_v11 = vsel %vm430_vm1, %v3160_v62, -inf }
 0x2f9   : > { %v3178_v12 = vpop.f32.mrf.mxu3 }
 0x2fb   : > { %v3182_v14 = vpop.f32.mrf.mxu0 }
 0x2fc   : > { %v1108_v16 = vsel %vm430_vm1, %v3182_v14, -inf }
 0x2fd   : > { %1154 = vmax.xlane.f32.xlu0 %v1153_v13  ;;  %1151 = vmax.xlane.f32.xlu1 %v1150_v15  ;;  %v3260_v13 = vpop.f32.mrf.mxu2 }
 0x2fe   : > { %1109 = vmax.xlane.f32.xlu2 %v1108_v16  ;;  %v1171_v16 = vsel %vm430_vm1, %v3260_v13, -inf }
 0x301   : > { %v3190_v18 = vpop.f32.mrf.mxu3 }
 0x302   : > { %v1180_v38 = vsel %vm430_vm1, %v3190_v18, -inf }
 0x303   : > { %v3192_v19 = vpop.f32.mrf.mxu0 }
 0x304   : > { %v1111_v3 = vsel %vm430_vm1, %v3192_v19, -inf }
 0x305   : > { %1133 = vmax.xlane.f32.xlu0 %v1132_v24  ;;  %1112 = vmax.xlane.f32.xlu1 %v1111_v3 }
 0x306   : > { %1157 = vmax.xlane.f32.xlu2 %v1156_v23 }
 0x309   : > { %v3202_v25 = vpop.f32.mrf.mxu3 }
 0x30a   : > { %v1183_v5 = vsel %vm430_vm1, %v3202_v25, -inf }
 0x30b   : > { %v3206_v27 = vpop.f32.mrf.mxu0 }
 0x30c   : > { %v1114_v28 = vsel %vm430_vm1, %v3206_v27, -inf }
 0x30d   : > { %1160 = vmax.xlane.f32.xlu1 %v1159_v26  ;;  %1115 = vmax.xlane.f32.xlu0 %v1114_v28 }
 0x30e   : > { %1136 = vmax.xlane.f32.xlu2 %v1135_v29  ;;  %v1177_v29 = vsel %vm430_vm1, %v3178_v12, -inf }
 0x311   : > { %v3212_v30 = vpop.f32.mrf.mxu3 }
 0x312   : > { %v1186_v10 = vsel %vm430_vm1, %v3212_v30, -inf }
 0x313   : > { %v3214_v32 = vpop.f32.mrf.mxu0 }
 0x314   : > { %v1117_v35 = vsel %vm430_vm1, %v3214_v32, -inf }
 0x315   : > { %1139 = vmax.xlane.f32.xlu1 %v1138_v33  ;;  %1142 = vmax.xlane.f32.xlu0 %v1141_v34 }
 0x316   : > { %1118 = vmax.xlane.f32.xlu2 %v1117_v35 }
 0x319   : > { %v3224_v37 = vpop.f32.mrf.mxu3 }
 0x31a   : > { %v1189_v24 = vsel %vm430_vm1, %v3224_v37, -inf }
 0x31b   : > { %v3228_v39 = vpop.f32.mrf.mxu0 }
 0x31c   : > { %v1120_v2 = vsel %vm430_vm1, %v3228_v39, -inf }
 0x31d   : > { %1181 = vmax.xlane.f32.xlu0 %v1180_v38  ;;  %1121 = vmax.xlane.f32.xlu1 %v1120_v2 }
 0x31e   : > { %1163 = vmax.xlane.f32.xlu2 %v1162_v40 }
 0x321   : > { %v3236_v42 = vpop.f32.mrf.mxu3 }
 0x322   : > { %v1192_v44 = vsel %vm430_vm1, %v3236_v42, -inf }
 0x323   : > { %v3240_v0 = vpop.f32.mrf.mxu0 }
 0x324   : > { %v1123_v47 = vsel %vm430_vm1, %v3240_v0, -inf }
 0x325   : > { %1193 = vmax.xlane.f32.xlu0 %v1192_v44  ;;  %1124 = vmax.xlane.f32.xlu1 %v1123_v47 }
 0x326   : > { %1166 = vmax.xlane.f32.xlu2 %v1165_v46  ;;  %v1128_v15 = vpop.xlane.xlu2 %1127 }
 0x327   : > { %v1206_v23 = vsub.f32 %v3142_v53, %v1128_v15 }
 0x329   : > { %v1246_v3 = vmul.f32 1.442695, %v1206_v23  ;;  %v3267_v26 = vpop.f32.mrf.mxu3 }
 0x32a   : > { %v1195_v28 = vsel %vm430_vm1, %v3267_v26, -inf }
 0x32b   : > { %2611 = vpow2.f32 %v1246_v3 }
 0x32d   : > { %1145 = vmax.xlane.f32.xlu1 %v1144_v48 }
 0x32e   : > { %1175 = vmax.xlane.f32.xlu2 %v1174_v50 }
 0x331   : > { %v3273_v33 = vpop.eup %2611 }
 0x332   : > { %v1318_v53 = vsel %vm430_vm1, %v3273_v33, 0.0 }
 0x335   : > { %1169 = vmax.xlane.f32.xlu1 %v1168_v54 }
 0x336   : > { %1184 = vmax.xlane.f32.xlu2 %v1183_v5 }
 0x33d   : > { %1148 = vmax.xlane.f32.xlu1 %v1147_v11 }
 0x33e   : > { %1187 = vmax.xlane.f32.xlu2 %v1186_v10 }
 0x345   : > { %1172 = vmax.xlane.f32.xlu1 %v1171_v16 }
 0x346   : > { %1190 = vmax.xlane.f32.xlu2 %v1189_v24 }
 0x34d   : > { %1178 = vmax.xlane.f32.xlu1 %v1177_v29 }
 0x34e   : > { %1196 = vmax.xlane.f32.xlu2 %v1195_v28 }
 0x355   : > { %1319 = vadd.xlane.f32.xlu1 %v1318_v53 }
 0x360   : > { %v3277_v34 = vpop.xlane.xlu0 %1103 }
 0x368   : > { %v1107_v35 = vpop.xlane.xlu1 %1106  ;;  %v1131_v38 = vpop.xlane.xlu0 %1130 }
 0x369   : > { %v1199_v40 = vsub.f32 %v3170_v7, %v1107_v35  ;;  %v1207_v2 = vsub.f32 %v3146_v55, %v1131_v38 }
 0x36b   : > { %v1232_v44 = vmul.f32 1.442695, %v1199_v40  ;;  %v1248_v46 = vmul.f32 1.442695, %v1207_v2 }
 0x36d   : > { %2613 = vpow2.f32 %v1232_v44 }
 0x36e   : > { %2615 = vpow2.f32 %v1248_v46 }
 0x370   : > { %v1152_v47 = vpop.xlane.xlu1 %1151  ;;  %v1155_v48 = vpop.xlane.xlu0 %1154 }
 0x371   : > { %v1214_v50 = vsub.f32 %v3162_v63, %v1152_v47  ;;  %v1110_v54 = vpop.xlane.xlu2 %1109  ;;  %v1215_v5 = vsub.f32 %v3172_v9, %v1155_v48 }
 0x372   : > { %v1200_v10 = vsub.f32 %v3182_v14, %v1110_v54 }
 0x373   : > { %v3284_v11 = vpop.eup %2613  ;;  %v1262_v15 = vmul.f32 1.442695, %v1214_v50  ;;  %v1264_v16 = vmul.f32 1.442695, %v1215_v5 }
 0x374   : > { %v3286_v7 = vpop.eup %2615  ;;  %v1234_v55 = vmul.f32 1.442695, %v1200_v10  ;;  %v1297_v23 = vsel %vm430_vm1, %v3284_v11, 0.0 }
 0x375   : > { %2617 = vpow2.f32 %v1262_v15  ;;  %1298 = vadd.xlane.f32.xlu0 %v1297_v23  ;;  %v1321_v63 = vsel %vm430_vm1, %v3286_v7, 0.0 }
 0x376   : > { %2619 = vpow2.f32 %v1234_v55  ;;  %1322 = vadd.xlane.f32.xlu2 %v1321_v63 }
 0x377   : > { %2621 = vpow2.f32 %v1264_v16 }
 0x378   : > { %v1113_v9 = vpop.xlane.xlu1 %1112  ;;  %v1134_v14 = vpop.xlane.xlu0 %1133 }
 0x379   : > { %v1158_v24 = vpop.xlane.xlu2 %1157  ;;  %v1201_v3 = vsub.f32 %v3192_v19, %v1113_v9  ;;  %v1208_v28 = vsub.f32 %v3148_v56, %v1134_v14 }
 0x37a   : > { %v1216_v29 = vsub.f32 %v3188_v17, %v1158_v24 }
 0x37b   : > { %v3295_v53 = vpop.eup %2617  ;;  %v1236_v35 = vmul.f32 1.442695, %v1201_v3  ;;  %v1250_v38 = vmul.f32 1.442695, %v1208_v28 }
 0x37c   : > { %v3297_v40 = vpop.eup %2619  ;;  %v1266_v2 = vmul.f32 1.442695, %v1216_v29  ;;  %v1342_v44 = vsel %vm430_vm1, %v3295_v53, 0.0 }
 0x37d   : > { %v3301_v46 = vpop.eup %2621  ;;  %2623 = vpow2.f32 %v1236_v35  ;;  %1343 = vadd.xlane.f32.xlu0 %v1342_v44  ;;  %v1300_v19 = vsel %vm430_vm1, %v3297_v40, 0.0 }
 0x37e   : > { %2625 = vpow2.f32 %v1266_v2  ;;  %1301 = vadd.xlane.f32.xlu1 %v1300_v19  ;;  %v1345_v56 = vsel %vm430_vm1, %v3301_v46, 0.0 }
 0x37f   : > { %2627 = vpow2.f32 %v1250_v38  ;;  %1346 = vadd.xlane.f32.xlu2 %v1345_v56 }
 0x380   : > { %v1161_v17 = vpop.xlane.xlu1 %1160  ;;  %v1116_v47 = vpop.xlane.xlu0 %1115 }
 0x381   : > { %v1137_v48 = vpop.xlane.xlu2 %1136  ;;  %v1217_v50 = vsub.f32 %v3200_v8, %v1161_v17  ;;  %v1202_v54 = vsub.f32 %v3206_v27, %v1116_v47 }
 0x382   : > { %v1209_v5 = vsub.f32 %v3150_v57, %v1137_v48 }
 0x383   : > { %v3310_v10 = vpop.eup %2623  ;;  %v1268_v15 = vmul.f32 1.442695, %v1217_v50  ;;  %v1238_v16 = vmul.f32 1.442695, %v1202_v54 }
 0x384   : > { %v3312_v55 = vpop.eup %2625  ;;  %v1252_v23 = vmul.f32 1.442695, %v1209_v5  ;;  %v1303_v63 = vsel %vm430_vm1, %v3310_v10, 0.0 }
 0x385   : > { %v3316_v9 = vpop.eup %2627  ;;  %2629 = vpow2.f32 %v1268_v15  ;;  %1304 = vadd.xlane.f32.xlu0 %v1303_v63  ;;  %v1348_v8 = vsel %vm430_vm1, %v3312_v55, 0.0 }
 0x386   : > { %2631 = vpow2.f32 %v1252_v23  ;;  %1349 = vadd.xlane.f32.xlu1 %v1348_v8  ;;  %v1324_v57 = vsel %vm430_vm1, %v3316_v9, 0.0 }
 0x387   : > { %2633 = vpow2.f32 %v1238_v16  ;;  %1325 = vadd.xlane.f32.xlu2 %v1324_v57 }
 0x388   : > { %v1140_v27 = vpop.xlane.xlu1 %1139  ;;  %v1143_v56 = vpop.xlane.xlu0 %1142 }
 0x389   : > { %v1210_v14 = vsub.f32 %v3152_v58, %v1140_v27  ;;  %v1119_v24 = vpop.xlane.xlu2 %1118  ;;  %v1211_v15 = vsub.f32 %v3154_v59, %v1143_v56 }
 0x38a   : > { %v1203_v3 = vsub.f32 %v3214_v32, %v1119_v24 }
 0x38b   : > { %v3324_v28 = vpop.eup %2629  ;;  %v1254_v29 = vmul.f32 1.442695, %v1210_v14 }
 0x38c   : > { %v3326_v35 = vpop.eup %2631  ;;  %v1240_v38 = vmul.f32 1.442695, %v1203_v3  ;;  %v1351_v2 = vsel %vm430_vm1, %v3324_v28, 0.0 }
 0x38d   : > { %v3330_v44 = vpop.eup %2633  ;;  %2635 = vpow2.f32 %v1254_v29  ;;  %1352 = vadd.xlane.f32.xlu0 %v1351_v2  ;;  %v1327_v19 = vsel %vm430_vm1, %v3326_v35, 0.0 }
 0x38e   : > { %2637 = vpow2.f32 %v1240_v38  ;;  %1328 = vadd.xlane.f32.xlu1 %v1327_v19  ;;  %v1306_v58 = vsel %vm430_vm1, %v3330_v44, 0.0 }
 0x38f   : > { %1307 = vadd.xlane.f32.xlu2 %v1306_v58 }
 0x390   : > { %v1122_v32 = vpop.xlane.xlu1 %1121 }
 0x391   : > { %v1164_v17 = vpop.xlane.xlu2 %1163  ;;  %v1204_v47 = vsub.f32 %v3228_v39, %v1122_v32  ;;  %v1256_v39 = vmul.f32 1.442695, %v1211_v15 }
 0x392   : > { %v1218_v48 = vsub.f32 %v3222_v36, %v1164_v17 }
 0x393   : > { %v3338_v50 = vpop.eup %2635  ;;  %v1242_v54 = vmul.f32 1.442695, %v1204_v47 }
 0x394   : > { %v3340_v5 = vpop.eup %2637  ;;  %v1270_v16 = vmul.f32 1.442695, %v1218_v48  ;;  %v1330_v23 = vsel %vm430_vm1, %v3338_v50, 0.0 }
 0x395   : > { %2639 = vpow2.f32 %v1242_v54  ;;  %1331 = vadd.xlane.f32.xlu0 %v1330_v23  ;;  %v1309_v63 = vsel %vm430_vm1, %v3340_v5, 0.0 }
 0x396   : > { %2641 = vpow2.f32 %v1270_v16  ;;  %1310 = vadd.xlane.f32.xlu1 %v1309_v63 }
 0x397   : > { %2643 = vpow2.f32 %v1256_v39 }
 0x398   : > { %v1125_v36 = vpop.xlane.xlu1 %1124 }
 0x399   : > { %v1167_v8 = vpop.xlane.xlu2 %1166  ;;  %v1205_v24 = vsub.f32 %v3240_v0, %v1125_v36 }
 0x39a   : > { %v1219_v57 = vsub.f32 %v3234_v41, %v1167_v8 }
 0x39b   : > { %v3348_v27 = vpop.eup %2639  ;;  %v1244_v38 = vmul.f32 1.442695, %v1205_v24 }
 0x39c   : > { %v3350_v14 = vpop.eup %2641  ;;  %v1272_v59 = vmul.f32 1.442695, %v1219_v57  ;;  %v1312_v3 = vsel %vm430_vm1, %v3348_v27, 0.0 }
 0x39d   : > { %1313 = vadd.xlane.f32.xlu0 %v1312_v3  ;;  %v1354_v29 = vsel %vm430_vm1, %v3350_v14, 0.0  ;;  %v3358_v58 = vpop.eup %2643 }
 0x39e   : > { %2645 = vpow2.f32 %v1272_v59  ;;  %1355 = vadd.xlane.f32.xlu2 %v1354_v29  ;;  %v1333_v17 = vsel %vm430_vm1, %v3358_v58, 0.0  ;;  %v1182_v29 = vpop.xlane.xlu0 %1181 }
 0x39f   : > { %2647 = vpow2.f32 %v1244_v38 }
 0x3a0   : > { %v1146_v2 = vpop.xlane.xlu1 %1145 }
 0x3a1   : > { %v1176_v41 = vpop.xlane.xlu2 %1175  ;;  %v1212_v19 = vsub.f32 %v3156_v60, %v1146_v2 }
 0x3a2   : > { %v1222_v23 = vsub.f32 %v3168_v6, %v1176_v41 }
 0x3a3   : > { %v1258_v32 = vmul.f32 1.442695, %v1212_v19 }
 0x3a4   : > { %v3360_v56 = vpop.eup %2645  ;;  %v1278_v36 = vmul.f32 1.442695, %v1222_v23 }
 0x3a5   : > { %2649 = vpow2.f32 %v1258_v32  ;;  %v1357_v0 = vsel %vm430_vm1, %v3360_v56, 0.0  ;;  %v3367_v60 = vpop.eup %2647 }
 0x3a6   : > { %1358 = vadd.xlane.f32.xlu1 %v1357_v0  ;;  %1334 = vadd.xlane.f32.xlu2 %v1333_v17  ;;  %v1315_v39 = vsel %vm430_vm1, %v3367_v60, 0.0  ;;  %v1224_v0 = vsub.f32 %v3190_v18, %v1182_v29 }
 0x3a8   : > { %v1170_v47 = vpop.xlane.xlu1 %1169 }
 0x3a9   : > { %v1185_v48 = vpop.xlane.xlu2 %1184  ;;  %v1220_v54 = vsub.f32 %v3250_v51, %v1170_v47 }
 0x3aa   : > { %v1225_v6 = vsub.f32 %v3202_v25, %v1185_v48  ;;  %v2853_v48 = vmov 5  }
 0x3ab   : > { %v3369_v15 = vpop.eup %2649  ;;  %v1274_v16 = vmul.f32 1.442695, %v1220_v54  ;;  %2586 = vset.pattern.permute.xlu2 %v2853_v48  ;;  %2587 = vset.pattern.permute.xlu1 %v2853_v48 }
 0x3ac   : > { %v1336_v63 = vsel %vm430_vm1, %v3369_v15, 0.0  ;;  %v1284_v38 = vmul.f32 1.442695, %v1225_v6  ;;  %2588 = vset.pattern.permute.xlu0 %v2853_v48 }
 0x3ad   : > { %2651 = vpow2.f32 %v1274_v16 }
 0x3ae   : > { %1337 = vadd.xlane.f32.xlu1 %v1336_v63  ;;  %1316 = vadd.xlane.f32.xlu2 %v1315_v39  ;;  %2653 = vpow2.f32 %v1278_v36 }
 0x3b0   : > { %v1149_v8 = vpop.xlane.xlu1 %1148 }
 0x3b1   : > { %v1188_v57 = vpop.xlane.xlu2 %1187  ;;  %v1213_v51 = vsub.f32 %v3160_v62, %v1149_v8 }
 0x3b2   : > { %v1226_v63 = vsub.f32 %v3212_v30, %v1188_v57 }
 0x3b3   : > { %v3377_v59 = vpop.eup %2651  ;;  %v1260_v24 = vmul.f32 1.442695, %v1213_v51 }
 0x3b4   : > { %v1360_v3 = vsel %vm430_vm1, %v3377_v59, 0.0  ;;  %v3383_v32 = vpop.eup %2653 }
 0x3b5   : > { %2655 = vpow2.f32 %v1260_v24  ;;  %v1366_v47 = vsel %vm430_vm1, %v3383_v32, 0.0 }
 0x3b6   : > { %1361 = vadd.xlane.f32.xlu1 %v1360_v3  ;;  %2657 = vpow2.f32 %v1284_v38  ;;  %v1286_v3 = vmul.f32 1.442695, %v1226_v63 }
 0x3b8   : > { %v1173_v2 = vpop.xlane.xlu1 %1172 }
 0x3b9   : > { %v1191_v41 = vpop.xlane.xlu2 %1190  ;;  %v1221_v19 = vsub.f32 %v3260_v13, %v1173_v2  ;;  %v1282_v13 = vmul.f32 1.442695, %v1224_v0 }
 0x3ba   : > { %v1227_v8 = vsub.f32 %v3224_v37, %v1191_v41 }
 0x3bb   : > { %v3385_v62 = vpop.eup %2655  ;;  %v1276_v17 = vmul.f32 1.442695, %v1221_v19 }
 0x3bc   : > { %v1339_v25 = vsel %vm430_vm1, %v3385_v62, 0.0  ;;  %v3393_v23 = vpop.eup %2657  ;;  %v1288_v30 = vmul.f32 1.442695, %v1227_v8  ;;  %v3448_v8 = vld [vmem:[%s3957_s8 + $0x18] sm:$0xff] }
 0x3bd   : > { %2659 = vpow2.f32 %v1276_v17  ;;  %1340 = vadd.xlane.f32.xlu0 %v1339_v25  ;;  %3984 = vst [vmem:[#allocation11_spill] sm:$0xff] %v3448_v8 }
 0x3be   : > { %1367 = vadd.xlane.f32.xlu1 %v1366_v47  ;;  %2661 = vpow2.f32 %v1282_v13 }
 0x3c0   : > { %v1179_v54 = vpop.xlane.xlu1 %1178 }
 0x3c1   : > { %v1197_v16 = vpop.xlane.xlu2 %1196  ;;  %v1223_v18 = vsub.f32 %v3178_v12, %v1179_v54  ;;  %v1375_v12 = vsel %vm430_vm1, %v3393_v23, 0.0 }
 0x3c2   : > { %v1229_v39 = vsub.f32 %v3267_v26, %v1197_v16  ;;  %v1194_v26 = vpop.xlane.xlu0 %1193 }
 0x3c3   : > { %v3397_v36 = vpop.eup %2659  ;;  %v1280_v51 = vmul.f32 1.442695, %v1223_v18  ;;  %v1228_v37 = vsub.f32 %v3236_v42, %v1194_v26  ;;  %v1198_v42 = vsub.f32 %v3164_v4, %v3277_v34  ;;  %v3438_v34 = vld [vmem:[%s3957_s8 + $0x10] sm:$0xff] }
 0x3c4   : > { %v1292_v24 = vmul.f32 1.442695, %v1229_v39  ;;  %v1363_v6 = vsel %vm430_vm1, %v3397_v36, 0.0  ;;  %v3404_v57 = vpop.eup %2661  ;;  %3983 = vst [vmem:[#allocation10_spill] sm:$0xff] %v3438_v34 }
 0x3c5   : > { %2663 = vpow2.f32 %v1280_v51  ;;  %1364 = vadd.xlane.f32.xlu2 %v1363_v6  ;;  %v1372_v41 = vsel %vm430_vm1, %v3404_v57, 0.0  ;;  %v1290_v0 = vmul.f32 1.442695, %v1228_v37  ;;  %v1230_v13 = vmul.f32 1.442695, %v1198_v42 }
 0x3c6   : > { %2665 = vpow2.f32 %v1292_v24  ;;  %1376 = vadd.xlane.f32.xlu1 %v1375_v12  ;;  %v3456_v12 = vld [vmem:[%s3957_s8] sm:$0xff] }
 0x3c7   : > { %2667 = vpow2.f32 %v1286_v3  ;;  %3985 = vst [vmem:[#allocation12_spill] sm:$0xff] %v3456_v12  ;;  %v3462_v3 = vld [vmem:[%s3957_s8 + $0x8] sm:$0xff] }
 0x3c8   : > { %2669 = vpow2.f32 %v1288_v30  ;;  %v3441_v63 = vpop.xlane.xlu1 %1319  ;;  %3986 = vst [vmem:[#allocation13_spill] sm:$0xff] %v3462_v3 }
 0x3c9   : > { %2671 = vpow2.f32 %v1290_v0 }
 0x3ca   : > { %2673 = vpow2.f32 %v1230_v13 }
 0x3cb   : > { %v3406_v29 = vpop.eup %2663 }
 0x3cc   : > { %v3409_v38 = vpop.eup %2665  ;;  %v1369_v2 = vsel %vm430_vm1, %v3406_v29, 0.0 }
 0x3cd   : > { %v1387_v19 = vsel %vm430_vm1, %v3409_v38, 0.0  ;;  %1370 = vadd.xlane.f32.xlu0 %v1369_v2  ;;  %1373 = vadd.xlane.f32.xlu2 %v1372_v41  ;;  %v3417_v17 = vpop.eup %2667 }
 0x3ce   : > { %1388 = vadd.xlane.f32.xlu1 %v1387_v19  ;;  %v3419_v25 = vpop.eup %2669  ;;  %v1378_v47 = vsel %vm430_vm1, %v3417_v17, 0.0 }
 0x3cf   : > { %v1381_v48 = vsel %vm430_vm1, %v3419_v25, 0.0  ;;  %v3427_v54 = vpop.eup %2671 }
 0x3d0   : > { %v1384_v16 = vsel %vm430_vm1, %v3427_v54, 0.0  ;;  %v3431_v18 = vpop.eup %2673 }
 0x3d1   : > { %v1294_v4 = vsel %vm430_vm1, %v3431_v18, 0.0 }
 0x3d5   : > { %1379 = vadd.xlane.f32.xlu0 %v1378_v47  ;;  %1382 = vadd.xlane.f32.xlu2 %v1381_v48 }
 0x3dd   : > { %1385 = vadd.xlane.f32.xlu0 %v1384_v16 }
 0x3e5   : > { %1295 = vadd.xlane.f32.xlu0 %v1294_v4 }
 0x3e7   : > { %665 = vperm.xlu1 %2587, %v3438_v34  }
 0x3e8   : > { %v1299_v51 = vpop.xlane.xlu0 %1298 }
 0x3e9   : > { %v3443_v39 = vpop.xlane.xlu2 %1322 }
 0x3ed   : > { %669 = vperm.xlu2 %2586, %v3448_v8  }
 0x3f0   : > { %v3465_v30 = vpop.xlane.xlu0 %1343 }
 0x3f1   : > { %v1302_v24 = vpop.xlane.xlu1 %1301 }
 0x3f2   : > { %v3451_v6 = vpop.xlane.xlu2 %1346 }
 0x3f5   : > { %657 = vperm.xlu2 %2586, %v3456_v12  }
 0x3f8   : > { %v1305_v2 = vpop.xlane.xlu0 %1304 }
 0x3f9   : > { %661 = vperm.xlu0 %2588, %v3462_v3   ;;  %v3467_v26 = vpop.xlane.xlu1 %1349 }
 0x3fa   : > { %v3469_v37 = vpop.xlane.xlu2 %1325 }
 0x400   : > { %v3471_v0 = vpop.xlane.xlu0 %1352 }
 0x401   : > { %v1329_v41 = vpop.xlane.xlu1 %1328 }
 0x402   : > { %v1308_v19 = vpop.xlane.xlu2 %1307 }
 0x408   : > { %v1332_v48 = vpop.xlane.xlu0 %1331 }
 0x409   : > { %v1311_v42 = vpop.xlane.xlu1 %1310 }
 0x410   : > { %v1314_v43 = vpop.xlane.xlu0 %1313 }
 0x411   : > { %v3473_v47 = vpop.xlane.xlu2 %1355 }
 0x419   : > { %v1359_v13 = vpop.xlane.xlu1 %1358  ;;  %v1335_v16 = vpop.xlane.xlu2 %1334 }
 0x421   : > { %v1338_v4 = vpop.xlane.xlu1 %1337  ;;  %v1317_v1 = vpop.xlane.xlu2 %1316 }
 0x422   : > { %2675 = vrcp.f32 %v1317_v1 }
 0x423   : > { %2677 = vrcp.f32 %v1314_v43 }
 0x424   : > { %2679 = vrcp.f32 %v1311_v42 }
 0x425   : > { %2681 = vrcp.f32 %v1308_v19 }
 0x426   : > { %2683 = vrcp.f32 %v1305_v2 }
 0x428   : > { %v2676_v31 = vpop.eup %2675 }
 0x429   : > { %v1362_v22 = vpop.xlane.xlu1 %1361  ;;  %v1429_v21 = vmul.f32 %v2676_v31, %v3367_v60  ;;  %v2678_v20 = vpop.eup %2677 }
 0x42a   : > { %v1428_v8 = vmul.f32 %v2678_v20, %v3348_v27  ;;  %v2680_v34 = vpop.eup %2679 }
 0x42b   : > { %2448 = vmatpush.xpose.msk.msrb.mxu0 %vm430_vm1, %v1429_v21  ;;  %v1427_v1 = vmul.f32 %v2680_v34, %v3340_v5  ;;  %v2682_v43 = vpop.eup %2681 }
 0x42c   : > { %v2684_v31 = vpop.eup %2683  ;;  %v1426_v21 = vmul.f32 %v2682_v43, %v3330_v44 }
 0x42d   : > { %v1425_v5 = vmul.f32 %v2684_v31, %v3310_v10 }
 0x42f   : > { %2449 = vmatpush.xpose.msk.msrb.mxu0 %vm430_vm1, %v1428_v8 }
 0x430   : > { %v1341_v3 = vpop.xlane.xlu0 %1340 }
 0x431   : > { %v3479_v12 = vpop.xlane.xlu1 %1367  ;;  %2685 = vrcp.f32 %v1341_v3 }
 0x432   : > { %2687 = vrcp.f32 %v1338_v4 }
 0x433   : > { %2450 = vmatpush.xpose.msk.msrb.mxu0 %vm430_vm1, %v1427_v1  ;;  %2689 = vrcp.f32 %v1302_v24 }
 0x434   : > { %2691 = vrcp.f32 %v1335_v16 }
 0x435   : > { %2693 = vrcp.f32 %v1299_v51 }
 0x437   : > { %v2686_v60 = vpop.eup %2685  ;;  %2451 = vmatpush.xpose.msk.msrb.mxu0 %vm430_vm1, %v1426_v21 }
 0x438   : > { %v1365_v20 = vpop.xlane.xlu2 %1364  ;;  %v1437_v27 = vmul.f32 %v2686_v60, %v3385_v62  ;;  %v2688_v8 = vpop.eup %2687 }
 0x439   : > { %v3486_v3 = vpop.xlane.xlu1 %1376  ;;  %2695 = vrcp.f32 %v1365_v20  ;;  %v2690_v34 = vpop.eup %2689  ;;  %v1436_v44 = vmul.f32 %v2688_v8, %v3369_v15 }
 0x43a   : > { %2697 = vrcp.f32 %v1332_v48  ;;  %2457 = vmatpush.xpose.msk.msrb.mxu1 %vm430_vm1, %v1437_v27  ;;  %v2692_v51 = vpop.eup %2691  ;;  %v1424_v62 = vmul.f32 %v2690_v34, %v3297_v40 }
 0x43b   : > { %2699 = vrcp.f32 %v1362_v22  ;;  %2452 = vmatpush.xpose.msk.msrb.mxu0 %vm430_vm1, %v1425_v5  ;;  %v2694_v24 = vpop.eup %2693  ;;  %v1435_v22 = vmul.f32 %v2692_v51, %v3358_v58 }
 0x43c   : > { %2701 = vrcp.f32 %v1329_v41  ;;  %v1423_v40 = vmul.f32 %v2694_v24, %v3284_v11 }
 0x43d   : > { %2703 = vrcp.f32 %v1359_v13 }
 0x43e   : > { %2458 = vmatpush.xpose.msk.msrb.mxu1 %vm430_vm1, %v1436_v44  ;;  %2705 = vrcp.f32 %v3469_v37 }
 0x43f   : > { %v2696_v2 = vpop.eup %2695  ;;  %2453 = vmatpush.xpose.msk.msrb.mxu0 %vm430_vm1, %v1424_v62 }
 0x440   : > { %v2698_v19 = vpop.eup %2697  ;;  %v1445_v10 = vmul.f32 %v2696_v2, %v3397_v36  ;;  %v3496_v42 = vpop.xlane.xlu0 %1370 }
 0x441   : > { %v2700_v48 = vpop.eup %2699  ;;  %v1389_v15 = vpop.xlane.xlu1 %1388  ;;  %v1434_v58 = vmul.f32 %v2698_v19, %v3338_v50 }
 0x442   : > { %2707 = vrcp.f32 %v1389_v15  ;;  %v3500_v41 = vpop.xlane.xlu2 %1373  ;;  %2459 = vmatpush.xpose.msk.msrb.mxu1 %vm430_vm1, %v1435_v22  ;;  %2466 = vmatpush.xpose.msk.msra.mxu2 %vm430_vm1, %v1445_v10  ;;  %v2702_v36 = vpop.eup %2701  ;;  %v1444_v13 = vmul.f32 %v2700_v48, %v3377_v59  ;;  %v3987_v10 = vld [vmem:[#allocation12_spill] sm:$0xff]  ;;  %v2856_v15 = vmov 7  }
 0x443   : > { %2709 = vrcp.f32 %v3473_v47  ;;  %2454 = vmatpush.xpose.msk.msrb.mxu0 %vm430_vm1, %v1423_v40  ;;  %v2704_v37 = vpop.eup %2703  ;;  %v1433_v47 = vmul.f32 %v2702_v36, %v3326_v35  ;;  %v1643_v36 = vld [vmem:[%s3954_s5 + $0x8] sm:$0xff] }
 0x444   : > { %2711 = vrcp.f32 %v3443_v39  ;;  %v2706_v11 = vpop.eup %2705  ;;  %v1443_v1 = vmul.f32 %v2704_v37, %v3360_v56  ;;  %v1645_v37 = vld [vmem:[%s3954_s5 + $0x18] sm:$0xff] }
 0x445   : > { %2713 = vrcp.f32 %v3471_v0  ;;  %v1432_v0 = vmul.f32 %v2706_v11, %v3316_v9 }
 0x446   : > { %2460 = vmatpush.xpose.msk.msrb.mxu1 %vm430_vm1, %v1434_v58  ;;  %2467 = vmatpush.xpose.msk.msra.mxu2 %vm430_vm1, %v1444_v13  ;;  %2715 = vrcp.f32 %v3441_v63  ;;  %v3991_v58 = vmov 0   ;;  %v1644_v13 = vld [vmem:[%s3954_s5 + $0x10] sm:$0xff] }
 0x447   : > { %2717 = vrcp.f32 %v3467_v26 }
 0x448   : > { %v2708_v16 = vpop.eup %2707  ;;  %v1380_v4 = vpop.xlane.xlu0 %1379  ;;  %2719 = vrcp.f32 %v3451_v6 }
 0x449   : > { %v2710_v43 = vpop.eup %2709  ;;  %v1453_v50 = vmul.f32 %v2708_v16, %v3409_v38 }
 0x44a   : > { %2461 = vmatpush.xpose.msk.msrb.mxu1 %vm430_vm1, %v1433_v47  ;;  %2468 = vmatpush.xpose.msk.msra.mxu2 %vm430_vm1, %v1443_v1  ;;  %v2712_v59 = vpop.eup %2711  ;;  %v1383_v39 = vpop.xlane.xlu2 %1382  ;;  %v1442_v35 = vmul.f32 %v2710_v43, %v3350_v14 }
 0x44b   : > { %2475 = vmatpush.xpose.msk.msrb.mxu3 %vm430_vm1, %v1453_v50  ;;  %v2714_v56 = vpop.eup %2713  ;;  %v1431_v31 = vmul.f32 %v2712_v59, %v3286_v7 }
 0x44c   : > { %v2716_v38 = vpop.eup %2715  ;;  %v1441_v26 = vmul.f32 %v2714_v56, %v3324_v28  ;;  %v3993_v56 = vld [vmem:[#allocation6_spill] sm:$0xff] }
 0x44d   : > { %v2718_v21 = vpop.eup %2717  ;;  %v1430_v9 = vmul.f32 %v2716_v38, %v3273_v33 }
 0x44e   : > { %2462 = vmatpush.xpose.msk.msrb.mxu1 %vm430_vm1, %v1432_v0  ;;  %2469 = vmatpush.xpose.msk.msra.mxu2 %vm430_vm1, %v1442_v35  ;;  %v1440_v14 = vmul.f32 %v2718_v21, %v3312_v55  ;;  %v2720_v6 = vpop.eup %2719  ;;  %v3992_v0 = vld [vmem:[#allocation5_spill] sm:$0xff] }
 0x450   : > { %v1386_v63 = vpop.xlane.xlu0 %1385 }
 0x451   : > { %2721 = vrcp.f32 %v1386_v63  ;;  %v3994_v63 = vld [vmem:[#allocation7_spill] sm:$0xff] }
 0x452   : > { %2723 = vrcp.f32 %v3465_v30  ;;  %2463 = vmatpush.xpose.msk.msrb.mxu1 %vm430_vm1, %v1431_v31  ;;  %2470 = vmatpush.xpose.msk.msra.mxu2 %vm430_vm1, %v1441_v26  ;;  %v670_v60 = vpop.permute.xlu2 %669  ;;  %v1439_v30 = vmul.f32 %v2720_v6, %v3301_v46 }
 0x453   : > { %2725 = vrcp.f32 %v1383_v39 }
 0x454   : > { %2727 = vrcp.f32 %v1380_v4 }
 0x456   : > { %2464 = vmatpush.xpose.msk.msrb.mxu1 %vm430_vm1, %v1430_v9  ;;  %2471 = vmatpush.xpose.msk.msra.mxu2 %vm430_vm1, %v1440_v14 }
 0x457   : > { %v2722_v7 = vpop.eup %2721 }
 0x458   : > { %v2724_v28 = vpop.eup %2723  ;;  %v1296_v20 = vpop.xlane.xlu0 %1295  ;;  %v1452_v27 = vmul.f32 %v2722_v7, %v3427_v54 }
 0x459   : > { %v2726_v8 = vpop.eup %2725  ;;  %2729 = vrcp.f32 %v1296_v20  ;;  %v666_v33 = vpop.permute.xlu1 %665  ;;  %v1438_v55 = vmul.f32 %v2724_v28, %v3295_v53  ;;  %v3995_v28 = vld [vmem:[#allocation8_spill] sm:$0xff] }
 0x45a   : > { %2472 = vmatpush.xpose.msk.msra.mxu2 %vm430_vm1, %v1439_v30  ;;  %2476 = vmatpush.xpose.msk.msrb.mxu3 %vm430_vm1, %v1452_v27  ;;  %2731 = vrcp.f32 %v3486_v3  ;;  %v1451_v5 = vmul.f32 %v2726_v8, %v3419_v25  ;;  %v2728_v34 = vpop.eup %2727  ;;  %v708_v54 = vadd.f32 %v3134_v49, %v666_v33  ;;  %v658_v44 = vpop.permute.xlu2 %657 }
 0x45b   : > { %2733 = vrcp.f32 %v3500_v41  ;;  %v1450_v3 = vmul.f32 %v2728_v34, %v3417_v17  ;;  %v702_v53 = vadd.f32 %v3158_v61, %v658_v44  ;;  %v1642_v41 = vld [vmem:[%s3954_s5] sm:$0xff] }
 0x45c   : > { %2735 = vrcp.f32 %v3496_v42  ;;  %v3990_v42 = vld [vmem:[#allocation11_spill] sm:$0xff]  ;;  %v3996_v44 = vld [vmem:[#allocation9_spill] sm:$0xff] }
 0x45d   : > { %2737 = vrcp.f32 %v3479_v12  ;;  %v711_v12 = vadd.f32 %v3140_v52, %v670_v60 }
 0x45e   : > { %2473 = vmatpush.xpose.msk.msra.mxu2 %vm430_vm1, %v1438_v55  ;;  %2477 = vmatpush.xpose.msk.msrb.mxu3 %vm430_vm1, %v1451_v5 }
 0x45f   : > { %v2730_v46 = vpop.eup %2729 }
 0x460   : > { %v1422_v51 = vmul.f32 %v2730_v46, %v3431_v18  ;;  %v2732_v24 = vpop.eup %2731 }
 0x461   : > { %2474 = vmatmul.msk.f32.vlgmr.msra.gmra.mxu2 %vm430_vm1, %v708_v54  ;;  %v1449_v25 = vmul.f32 %v2732_v24, %v3393_v23  ;;  %v2734_v62 = vpop.eup %2733 }
 0x462   : > { %2455 = vmatpush.xpose.msk.msrb.mxu0 %vm430_vm1, %v1422_v51  ;;  %2478 = vmatpush.xpose.msk.msrb.mxu3 %vm430_vm1, %v1450_v3  ;;  %v1448_v49 = vmul.f32 %v2734_v62, %v3404_v57  ;;  %v2736_v17 = vpop.eup %2735  ;;  %v2854_v57 = vmov 6   ;;  %v1829_v3 = vld [vmem:[%s3958_s9 + $0x78] sm:$0xff] }
 0x463   : > { %v1447_v19 = vmul.f32 %v2736_v17, %v3406_v29  ;;  %v2738_v61 = vpop.eup %2737  ;;  %2589 = vset.pattern.permute.xlu1 %v2854_v57  ;;  %2590 = vset.pattern.permute.xlu2 %v2854_v57  ;;  %v3989_v29 = vld [vmem:[#allocation10_spill] sm:$0xff]  ;;  %v1826_v57 = vld [vmem:[%s3958_s9 + $0x60] sm:$0xff] }
 0x464   : > { %v1446_v23 = vmul.f32 %v2738_v61, %v3383_v32  ;;  %1647 = vperm.xlu1 %2589, %v3987_v10   ;;  %v2855_v32 = vmov 8  }
 0x465   : > { %2456 = vmatmul.msk.f32.vlgmr.msrb.gmra.mxu0 %vm430_vm1, %v702_v53  ;;  %2593 = vset.pattern.permute.xlu0 %v2855_v32 }
 0x466   : > { %2479 = vmatpush.xpose.msk.msrb.mxu3 %vm430_vm1, %v1449_v25  ;;  %1791 = vperm.xlu0 %2593, %v3990_v42  }
 0x46a   : > { %2480 = vmatpush.xpose.msk.msrb.mxu3 %vm430_vm1, %v1448_v49 }
 0x46b   : > { %v662_v18 = vpop.permute.xlu0 %661 }
 0x46c   : > { %v705_v2 = vadd.f32 %v3129_v45, %v662_v18  ;;  %v3988_v45 = vld [vmem:[#allocation13_spill] sm:$0xff]  ;;  %1655 = vperm.xlu1 %2589, %v3989_v29  }
 0x46d   : > { %1651 = vperm.xlu2 %2590, %v3988_v45  }
 0x46e   : > { %2465 = vmatmul.msk.f32.vlgmr.msrb.gmra.mxu1 %vm430_vm1, %v705_v2  ;;  %2481 = vmatpush.xpose.msk.msrb.mxu3 %vm430_vm1, %v1447_v19 }
 0x46f   : > { %1779 = vperm.xlu0 %2593, %v3987_v10  }
 0x472   : > { %2482 = vmatpush.xpose.msk.msrb.mxu3 %vm430_vm1, %v1446_v23 }
 0x474   : > { %2591 = vset.pattern.permute.xlu1 %v2856_v15 }
 0x475   : > { %2483 = vmatmul.msk.f32.vlgmr.msrb.gmra.mxu3 %vm430_vm1, %v711_v12  ;;  %1659 = vperm.xlu2 %2590, %v3990_v42  }
 0x476   : > { %1771 = vperm.xlu1 %2591, %v3990_v42  }
 0x477   : > { %2597 = vset.pattern.permute.xlu0 %v3991_v58 }
 0x47d   : > { %2592 = vset.pattern.permute.xlu2 %v2856_v15 }
 0x47e   : > { %1767 = vperm.xlu2 %2592, %v3989_v29   ;;  %1763 = vperm.xlu1 %2591, %v3988_v45  }
 0x486   : > { %2594 = vset.pattern.permute.xlu2 %v2855_v32  ;;  %1759 = vperm.xlu1 %2591, %v3987_v10   ;;  %v1824_v32 = vld [vmem:[%s3958_s9 + $0x50] sm:$0xff] }
 0x487   : > { %1787 = vperm.xlu2 %2594, %v3989_v29  }
 0x48e   : > { %2595 = vset.pattern.permute.xlu1 %v3991_v58 }
 0x48f   : > { %1783 = vperm.xlu2 %2594, %v3988_v45   ;;  %1907 = vperm.xlu1 %2595, %v1829_v3  }
 0x497   : > { %2596 = vset.pattern.permute.xlu2 %v3991_v58  ;;  %1892 = vperm.xlu1 %2595, %v1826_v57   ;;  %v1806_v57 = vld [vmem:[%s3955_s6 + $0x40] sm:$0xff] }
 0x49f   : > { %1882 = vperm.xlu1 %2595, %v1824_v32   ;;  %v1814_v32 = vld [vmem:[%s3958_s9] sm:$0xff] }
 0x4c7   : > { %v1652_v47 = vpop.permute.xlu2 %1651 }
 0x4cf   : > { %v1660_v21 = vpop.permute.xlu2 %1659 }
 0x4d6   : > { %v1648_v16 = vpop.permute.xlu1 %1647 }
 0x4de   : > { %v1656_v43 = vpop.permute.xlu1 %1655 }
 0x4e2   : > { %v1498_v40 = vpop.f32.mrf.mxu0 }
 0x4e4   : > { %v1592_v48 = vpop.f32.mrf.mxu2 }
 0x4eb   : > { %v1545_v52 = vpop.f32.mrf.mxu1 }
 0x4f8   : > { %v1639_v22 = vpop.f32.mrf.mxu3 }
 0x4f9   : > { %1686 = vmatpush.msra.mxu0 %v1639_v22 }
 0x4fb   : > { %1687 = vmatpush.msra.mxu0 %v1592_v48 }
 0x4fd   : > { %1688 = vmatpush.msra.mxu0 %v1545_v52 }
 0x4ff   : > { %1689 = vmatpush.msra.mxu0 %v1498_v40  ;;  %v1821_v40 = vld [vmem:[%s3958_s9 + $0x38] sm:$0xff] }
 0x500   : > { %2484 = vmatmul.msk.f32.vlgmr.msra.gmra.mxu0 %vm549_vm6, %v1642_v41  ;;  %1867 = vperm.xlu1 %2595, %v1821_v40  }
 0x508   : > { %2485 = vmatmul.msk.f32.gmra.mxu0 %vm549_vm6, %v1643_v36  ;;  %v1827_v36 = vld [vmem:[%s3958_s9 + $0x68] sm:$0xff] }
 0x509   : > { %1897 = vperm.xlu0 %2597, %v1827_v36  }
 0x510   : > { %2486 = vmatmul.msk.f32.gmra.mxu0 %vm549_vm6, %v1644_v13 }
 0x518   : > { %2487 = vmatmul.msk.f32.gmra.mxu0 %vm549_vm6, %v1645_v37  ;;  %v1772_v37 = vpop.permute.xlu1 %1771 }
 0x57d   : > { %v1691_v11 = vpop.f32.mrf.mxu0 }
 0x57e   : > { %v1692_v59 = vadd.f32 %v1691_v11, %v1648_v16  ;;  %v1818_v11 = vld [vmem:[%s3958_s9 + $0x20] sm:$0xff] }
 0x57f   : > { %v1822_v16 = vld [vmem:[%s3958_s9 + $0x40] sm:$0xff]  ;;  %1852 = vperm.xlu1 %2595, %v1818_v11  }
 0x580   : > { %v3602_v38 = vadd.f32 %v1692_v59, %v3993_v56  ;;  %1872 = vperm.xlu0 %2597, %v1822_v16   ;;  %v1815_v59 = vld [vmem:[%s3958_s9 + $0x8] sm:$0xff]  ;;  %v1764_v56 = vpop.permute.xlu1 %1763 }
 0x582   : > { %v1707_v14 = vsel %vm430_vm1, %v3602_v38, 0.0 }
 0x585   : > { %v1694_v4 = vpop.f32.mrf.mxu0 }
 0x586   : > { %v1695_v1 = vadd.f32 %v1694_v4, %v1652_v47  ;;  %v1768_v4 = vpop.permute.xlu2 %1767 }
 0x587   : > { %1837 = vperm.xlu1 %2595, %v1815_v59  }
 0x588   : > { %v3599_v35 = vadd.f32 %v1695_v1, %v3992_v0 }
 0x58a   : > { %v1708_v26 = vsel %vm430_vm1, %v3599_v35, 0.0 }
 0x58b   : > { %v1709_v7 = vadd.f32 %v1708_v26, %v1707_v14 }
 0x58d   : > { %v1697_v50 = vpop.f32.mrf.mxu0 }
 0x58e   : > { %v1698_v39 = vadd.f32 %v1697_v50, %v1656_v43  ;;  %v1788_v26 = vpop.permute.xlu2 %1787 }
 0x590   : > { %v3605_v31 = vadd.f32 %v1698_v39, %v3994_v63  ;;  %v1819_v39 = vld [vmem:[%s3958_s9 + $0x28] sm:$0xff] }
 0x591   : > { %1857 = vperm.xlu0 %2597, %v1819_v39  }
 0x592   : > { %v1710_v6 = vsel %vm430_vm1, %v3605_v31, 0.0 }
 0x593   : > { %v1711_v30 = vadd.f32 %v1710_v6, %v1709_v7  ;;  %v1828_v7 = vld [vmem:[%s3958_s9 + $0x70] sm:$0xff] }
 0x594   : > { %1902 = vperm.xlu2 %2596, %v1828_v7  }
 0x595   : > { %v1700_v9 = vpop.f32.mrf.mxu0 }
 0x596   : > { %v1701_v60 = vadd.f32 %v1700_v9, %v1660_v21  ;;  %v1792_v9 = vpop.permute.xlu0 %1791 }
 0x598   : > { %v3614_v20 = vadd.f32 %v1701_v60, %v3995_v28  ;;  %v1816_v28 = vld [vmem:[%s3958_s9 + $0x10] sm:$0xff] }
 0x599   : > { %1842 = vperm.xlu0 %2597, %v1816_v28  }
 0x59a   : > { %v1712_v27 = vsel %vm430_vm1, %v3614_v20, 0.0 }
 0x59b   : > { %v1713_v8 = vadd.f32 %v1712_v27, %v1711_v30 }
 0x59d   : > { %v1714_v33 = vrot.slane %v1713_v8, 4 }
 0x59e   : > { %v1780_v3 = vpop.permute.xlu0 %1779 }
 0x59f   : > { %v1715_v55 = vadd.f32 %v1714_v33, %v1713_v8 }
 0x5a1   : > { %v1716_v5 = vrot.slane %v1715_v55, 2 }
 0x5a3   : > { %v1717_v34 = vadd.f32 %v1716_v5, %v1715_v55  ;;  %v1760_v5 = vpop.permute.xlu1 %1759 }
 0x5a5   : > { %v1718_v46 = vrot.slane %v1717_v34, 1 }
 0x5a7   : > { %v1719_v54 = vadd.f32 %v1718_v46, %v1717_v34 }
 0x5a9   : > { %v1720_v51 = vmul.f32 %v1719_v54, %v3996_v44  ;;  %v1784_v54 = vpop.permute.xlu2 %1783 }
 0x5ab   : > { %v1723_v24 = vsub.f32 %v3605_v31, %v1720_v51  ;;  %v1721_v53 = vsub.f32 %v3602_v38, %v1720_v51  ;;  %v1722_v25 = vsub.f32 %v3599_v35, %v1720_v51  ;;  %v1724_v62 = vsub.f32 %v3614_v20, %v1720_v51 }
 0x5ad   : > { %v1725_v49 = vmul.f32 %v1721_v53, %v1721_v53  ;;  %v1726_v17 = vmul.f32 %v1722_v25, %v1722_v25  ;;  %v1727_v18 = vmul.f32 %v1723_v24, %v1723_v24  ;;  %v1728_v2 = vmul.f32 %v1724_v62, %v1724_v62 }
 0x5af   : > { %v1729_v19 = vsel %vm430_vm1, %v1725_v49, 0.0  ;;  %v1730_v61 = vsel %vm430_vm1, %v1726_v17, 0.0  ;;  %v1732_v12 = vsel %vm430_vm1, %v1727_v18, 0.0  ;;  %v1734_v45 = vsel %vm430_vm1, %v1728_v2, 0.0  ;;  %v1800_v49 = vld [vmem:[%s3955_s6 + $0x10] sm:$0xff]  ;;  %v1801_v18 = vld [vmem:[%s3955_s6 + $0x18] sm:$0xff] }
 0x5b0   : > { %v1731_v23 = vadd.f32 %v1730_v61, %v1729_v19  ;;  %v1820_v17 = vld [vmem:[%s3958_s9 + $0x30] sm:$0xff]  ;;  %v1817_v2 = vld [vmem:[%s3958_s9 + $0x18] sm:$0xff]  ;;  %v1802_v19 = vld [vmem:[%s3955_s6 + $0x20] sm:$0xff] }
 0x5b1   : > { %v1803_v61 = vld [vmem:[%s3955_s6 + $0x28] sm:$0xff] }
 0x5b2   : > { %v1733_v10 = vadd.f32 %v1732_v12, %v1731_v23  ;;  %v1804_v23 = vld [vmem:[%s3955_s6 + $0x30] sm:$0xff]  ;;  %v1805_v12 = vld [vmem:[%s3955_s6 + $0x38] sm:$0xff] }
 0x5b4   : > { %v1735_v29 = vadd.f32 %v1734_v45, %v1733_v10  ;;  %v1798_v10 = vld [vmem:[%s3955_s6] sm:$0xff]  ;;  %v1807_v45 = vld [vmem:[%s3955_s6 + $0x48] sm:$0xff] }
 0x5b6   : > { %v1736_v42 = vrot.slane %v1735_v29, 4 }
 0x5b8   : > { %v1737_v22 = vadd.f32 %v1736_v42, %v1735_v29  ;;  %v1808_v29 = vld [vmem:[%s3955_s6 + $0x50] sm:$0xff]  ;;  %v1809_v42 = vld [vmem:[%s3955_s6 + $0x58] sm:$0xff] }
 0x5ba   : > { %v1738_v48 = vrot.slane %v1737_v22, 2 }
 0x5bc   : > { %v1739_v15 = vadd.f32 %v1738_v48, %v1737_v22  ;;  %v1810_v22 = vld [vmem:[%s3955_s6 + $0x60] sm:$0xff]  ;;  %v1811_v48 = vld [vmem:[%s3955_s6 + $0x68] sm:$0xff] }
 0x5be   : > { %v1740_v52 = vrot.slane %v1739_v15, 1 }
 0x5c0   : > { %v1741_v41 = vadd.f32 %v1740_v52, %v1739_v15  ;;  %v1812_v15 = vld [vmem:[%s3955_s6 + $0x70] sm:$0xff]  ;;  %v1813_v52 = vld [vmem:[%s3955_s6 + $0x78] sm:$0xff] }
 0x5c2   : > { %v1742_v58 = vmul.f32 %v1741_v41, %v3996_v44 }
 0x5c4   : > { %v1743_v13 = vadd.f32 1e-06, %v1742_v58 }
 0x5c6   : > { %2739 = vrsqrt.f32 %v1743_v13  ;;  %vm1750_vm9 = vweird.f32 %v1743_v13 }
 0x5cc   : > { %v2740_v47 = vpop.eup %2739 }
 0x5cd   : > { %v1745_v1 = vmul.f32 %v2740_v47, %v1743_v13  ;;  %vm1751_vm8 = vweird.f32 %v2740_v47 }
 0x5ce   : > { %vm1752_vm10 = vmor %vm1750_vm9, %vm1751_vm8 }
 0x5cf   : > { %v1746_v43 = vmul.f32 %v2740_v47, %v1745_v1 }
 0x5d1   : > { %v1747_v50 = vmul.f32 0.5, %v1746_v43 }
 0x5d3   : > { %v1748_v0 = vsub.f32 1.5, %v1747_v50 }
 0x5d5   : > { %v1749_v63 = vmul.f32 %v2740_v47, %v1748_v0 }
 0x5d7   : > { %v1753_v21 = vsel %vm1752_vm10, %v2740_v47, %v1749_v63  ;;  %v1908_v47 = vpop.permute.xlu1 %1907 }
 0x5d8   : > { %v1757_v14 = vmul.f32 %v1753_v21, %v1724_v62  ;;  %v1756_v6 = vmul.f32 %v1753_v21, %v1723_v24  ;;  %v1755_v60 = vmul.f32 %v1753_v21, %v1722_v25  ;;  %v1754_v8 = vmul.f32 %v1753_v21, %v1721_v53  ;;  %v1825_v24 = vld [vmem:[%s3958_s9 + $0x58] sm:$0xff]  ;;  %v1799_v53 = vld [vmem:[%s3955_s6 + $0x8] sm:$0xff] }
 0x5d9   : > { %1887 = vperm.xlu2 %2596, %v1825_v24   ;;  %v1823_v62 = vld [vmem:[%s3958_s9 + $0x48] sm:$0xff] }
 0x5da   : > { %v1777_v30 = vmul.f32 %v1772_v37, %v1757_v14  ;;  %v1776_v27 = vmul.f32 %v1768_v4, %v1756_v6  ;;  %v1775_v33 = vmul.f32 %v1764_v56, %v1755_v60  ;;  %v1774_v46 = vmul.f32 %v1760_v5, %v1754_v8  ;;  %v1898_v56 = vpop.permute.xlu0 %1897 }
 0x5dc   : > { %v1797_v55 = vadd.f32 %v1792_v9, %v1777_v30  ;;  %v1796_v34 = vadd.f32 %v1788_v26, %v1776_v27  ;;  %v1795_v51 = vadd.f32 %v1784_v54, %v1775_v33  ;;  %v1794_v25 = vadd.f32 %v1780_v3, %v1774_v46 }
 0x5de   : > { %1970 = vmatpush.msrb.mxu0 %v1797_v55  ;;  %2515 = vmatpush.msra.mxu1 %v1797_v55 }
 0x5df   : > { %v1893_v59 = vpop.permute.xlu1 %1892 }
 0x5e0   : > { %1971 = vmatpush.msrb.mxu0 %v1796_v34  ;;  %2516 = vmatpush.msra.mxu1 %v1796_v34 }
 0x5e1   : > { %1877 = vperm.xlu2 %2596, %v1823_v62  }
 0x5e2   : > { %1972 = vmatpush.msrb.mxu0 %v1795_v51  ;;  %2517 = vmatpush.msra.mxu1 %v1795_v51 }
 0x5e4   : > { %1973 = vmatpush.msrb.mxu0 %v1794_v25  ;;  %2518 = vmatpush.msra.mxu1 %v1794_v25 }
 0x5e5   : > { %2489 = vmatmul.msk.f32.vlgmr.msra.gmra.mxu1 %vm549_vm6, %v1799_v53  ;;  %2488 = vmatmul.msk.f32.vlgmr.msrb.gmra.mxu0 %vm549_vm6, %v1798_v10 }
 0x5e7   : > { %v1883_v63 = vpop.permute.xlu1 %1882 }
 0x5e9   : > { %1862 = vperm.xlu2 %2596, %v1820_v17  }
 0x5ed   : > { %2490 = vmatmul.msk.f32.gmra.mxu1 %vm549_vm6, %v1800_v49 }
 0x5ee   : > { %v1903_v43 = vpop.permute.xlu2 %1902 }
 0x5ef   : > { %v1868_v6 = vpop.permute.xlu1 %1867 }
 0x5f1   : > { %1847 = vperm.xlu2 %2596, %v1817_v2  }
 0x5f2   : > { %v1873_v9 = vpop.permute.xlu0 %1872 }
 0x5f5   : > { %2491 = vmatmul.msk.f32.gmra.mxu1 %vm549_vm6, %v1801_v18 }
 0x5f7   : > { %v1853_v25 = vpop.permute.xlu1 %1852 }
 0x5f9   : > { %1832 = vperm.xlu2 %2596, %v1814_v32  }
 0x5fd   : > { %2492 = vmatmul.msk.f32.gmra.mxu1 %vm549_vm6, %v1802_v19 }
 0x603   : > { %v1858_v46 = vpop.permute.xlu0 %1857 }
 0x605   : > { %2493 = vmatmul.msk.f32.gmra.mxu1 %vm549_vm6, %v1803_v61 }
 0x60d   : > { %2494 = vmatmul.msk.f32.gmra.mxu1 %vm549_vm6, %v1804_v23 }
 0x615   : > { %2495 = vmatmul.msk.f32.gmra.mxu1 %vm549_vm6, %v1805_v12 }
 0x61d   : > { %2496 = vmatmul.msk.f32.gmra.mxu1 %vm549_vm6, %v1806_v57 }
 0x625   : > { %2497 = vmatmul.msk.f32.gmra.mxu1 %vm549_vm6, %v1807_v45 }
 0x62d   : > { %2498 = vmatmul.msk.f32.gmra.mxu1 %vm549_vm6, %v1808_v29 }
 0x633   : > { %v1888_v39 = vpop.permute.xlu2 %1887 }
 0x635   : > { %2499 = vmatmul.msk.f32.gmra.mxu1 %vm549_vm6, %v1809_v42 }
 0x63b   : > { %v1878_v26 = vpop.permute.xlu2 %1877 }
 0x63d   : > { %2500 = vmatmul.msk.f32.gmra.mxu1 %vm549_vm6, %v1810_v22 }
 0x643   : > { %v1863_v8 = vpop.permute.xlu2 %1862 }
 0x645   : > { %2501 = vmatmul.msk.f32.gmra.mxu1 %vm549_vm6, %v1811_v48 }
 0x64b   : > { %v1848_v22 = vpop.permute.xlu2 %1847 }
 0x64d   : > { %2502 = vmatmul.msk.f32.gmra.mxu1 %vm549_vm6, %v1812_v15 }
 0x655   : > { %2503 = vmatmul.msk.f32.gmra.mxu1 %vm549_vm6, %v1813_v52 }
 0x662   : > { %v3740_v41 = vpop.f32.mrf.mxu1 }
 0x66a   : > { %v3742_v40 = vpop.f32.mrf.mxu1 }
 0x672   : > { %v3744_v36 = vpop.f32.mrf.mxu1 }
 0x67a   : > { %v1987_v58 = vpop.f32.mrf.mxu1 }
 0x682   : > { %v1990_v13 = vpop.f32.mrf.mxu1 }
 0x683   : > { %v3783_v32 = vadd.f32 %v1990_v13, %v1858_v46 }
 0x68a   : > { %v1993_v37 = vpop.f32.mrf.mxu1 }
 0x68b   : > { %v3776_v12 = vadd.f32 %v1993_v37, %v1863_v8 }
 0x692   : > { %v1996_v11 = vpop.f32.mrf.mxu1 }
 0x693   : > { %v3770_v2 = vadd.f32 %v1996_v11, %v1868_v6 }
 0x695   : > { %v2046_v15 = vmul.f32 0.044715, %v3770_v2 }
 0x69a   : > { %v1999_v16 = vpop.f32.mrf.mxu1 }
 0x69b   : > { %v3764_v24 = vadd.f32 %v1999_v16, %v1873_v9  ;;  %v3790_v16 = vadd.f32 %v1987_v58, %v1853_v25  ;;  %v1838_v58 = vpop.permute.xlu1 %1837  ;;  %v2062_v9 = vmul.f32 %v2046_v15, %v3770_v2 }
 0x69d   : > { %v2047_v57 = vmul.f32 0.044715, %v3764_v24 }
 0x6a2   : > { %v2002_v4 = vpop.f32.mrf.mxu1 }
 0x6a3   : > { %v3760_v54 = vadd.f32 %v2002_v4, %v1878_v26  ;;  %v2045_v4 = vmul.f32 0.044715, %v3776_v12 }
 0x6a5   : > { %v2048_v19 = vmul.f32 0.044715, %v3760_v54 }
 0x6a7   : > { %v2064_v11 = vmul.f32 %v2048_v19, %v3760_v54 }
 0x6aa   : > { %v2005_v1 = vpop.f32.mrf.mxu1 }
 0x6ab   : > { %v3755_v33 = vadd.f32 %v2005_v1, %v1883_v63  ;;  %v1843_v1 = vpop.permute.xlu0 %1842 }
 0x6ac   : > { %v3806_v6 = vadd.f32 %v3742_v40, %v1843_v1 }
 0x6ad   : > { %v2049_v53 = vmul.f32 0.044715, %v3755_v33 }
 0x6af   : > { %v2065_v42 = vmul.f32 %v2049_v53, %v3755_v33 }
 0x6b2   : > { %v2008_v50 = vpop.f32.mrf.mxu1 }
 0x6b3   : > { %v3751_v30 = vadd.f32 %v2008_v50, %v1888_v39  ;;  %v3798_v39 = vadd.f32 %v3744_v36, %v1848_v22 }
 0x6b5   : > { %v2050_v51 = vmul.f32 0.044715, %v3751_v30  ;;  %v2042_v46 = vmul.f32 0.044715, %v3798_v39 }
 0x6b7   : > { %v2066_v23 = vmul.f32 %v2050_v51, %v3751_v30  ;;  %v1833_v51 = vpop.permute.xlu2 %1832 }
 0x6b9   : > { %v2082_v37 = vmul.f32 %v2066_v23, %v3751_v30 }
 0x6ba   : > { %v2011_v0 = vpop.f32.mrf.mxu1 }
 0x6bb   : > { %v3748_v60 = vadd.f32 %v2011_v0, %v1893_v59  ;;  %v2081_v59 = vmul.f32 %v2065_v42, %v3755_v33  ;;  %v2044_v0 = vmul.f32 0.044715, %v3783_v32  ;;  %v2098_v26 = vadd.f32 %v2082_v37, %v3751_v30 }
 0x6bd   : > { %v2051_v55 = vmul.f32 0.044715, %v3748_v60  ;;  %v2060_v40 = vmul.f32 %v2044_v0, %v3783_v32  ;;  %v2114_v25 = vmul.f32 0.7978846, %v2098_v26 }
 0x6bf   : > { %v2067_v49 = vmul.f32 %v2051_v55, %v3748_v60  ;;  %v2076_v22 = vmul.f32 %v2060_v40, %v3783_v32 }
 0x6c1   : > { %v2083_v29 = vmul.f32 %v2067_v49, %v3748_v60  ;;  %v2041_v49 = vmul.f32 0.044715, %v3806_v6 }
 0x6c2   : > { %v2014_v21 = vpop.f32.mrf.mxu1 }
 0x6c3   : > { %v3746_v14 = vadd.f32 %v2014_v21, %v1898_v56  ;;  %v2099_v50 = vadd.f32 %v2083_v29, %v3748_v60  ;;  %v2080_v21 = vmul.f32 %v2064_v11, %v3760_v54 }
 0x6c5   : > { %v2052_v7 = vmul.f32 0.044715, %v3746_v14  ;;  %v2115_v55 = vmul.f32 0.7978846, %v2099_v50  ;;  %v2096_v53 = vadd.f32 %v2080_v21, %v3760_v54 }
 0x6c7   : > { %v2068_v34 = vmul.f32 %v2052_v7, %v3746_v14  ;;  %v2043_v7 = vmul.f32 0.044715, %v3790_v16  ;;  %v2112_v29 = vmul.f32 0.7978846, %v2096_v53 }
 0x6c9   : > { %v2084_v18 = vmul.f32 %v2068_v34, %v3746_v14  ;;  %v3813_v34 = vadd.f32 %v3740_v41, %v1838_v58  ;;  %v2059_v41 = vmul.f32 %v2043_v7, %v3790_v16 }
 0x6ca   : > { %v2017_v28 = vpop.f32.mrf.mxu1 }
 0x6cb   : > { %v3753_v27 = vadd.f32 %v2017_v28, %v1903_v43  ;;  %v2100_v48 = vadd.f32 %v2084_v18, %v3746_v14  ;;  %v2061_v28 = vmul.f32 %v2045_v4, %v3776_v12  ;;  %v2075_v15 = vmul.f32 %v2059_v41, %v3790_v16 }
 0x6cd   : > { %v2053_v5 = vmul.f32 0.044715, %v3753_v27  ;;  %v2116_v56 = vmul.f32 0.7978846, %v2100_v48  ;;  %v2037_v26 = vmul.f32 0.5, %v3753_v27 }
 0x6cf   : > { %v2069_v3 = vmul.f32 %v2053_v5, %v3753_v27  ;;  %v2097_v5 = vadd.f32 %v2081_v59, %v3755_v33 }
 0x6d1   : > { %v2085_v62 = vmul.f32 %v2069_v3, %v3753_v27  ;;  %v1975_v3 = vpop.f32.mrf.mxu0  ;;  %v2113_v19 = vmul.f32 0.7978846, %v2097_v5 }
 0x6d2   : > { %v2020_v17 = vpop.f32.mrf.mxu1  ;;  %v3822_v18 = vadd.f32 %v1975_v3, %v1833_v51 }
 0x6d3   : > { %v3773_v61 = vadd.f32 %v2020_v17, %v1908_v47  ;;  %v2101_v45 = vadd.f32 %v2085_v62, %v3753_v27  ;;  %v2063_v47 = vmul.f32 %v2047_v57, %v3764_v24  ;;  %v2078_v62 = vmul.f32 %v2062_v9, %v3770_v2 }
 0x6d4   : > { %v2077_v17 = vmul.f32 %v2061_v28, %v3776_v12  ;;  %v2040_v57 = vmul.f32 0.044715, %v3813_v34  ;;  %v2039_v11 = vmul.f32 0.044715, %v3822_v18 }
 0x6d5   : > { %v2054_v10 = vmul.f32 0.044715, %v3773_v61  ;;  %v2117_v43 = vmul.f32 0.7978846, %v2101_v45  ;;  %v2079_v36 = vmul.f32 %v2063_v47, %v3764_v24  ;;  %v2094_v42 = vadd.f32 %v2078_v62, %v3770_v2 }
 0x6d6   : > { %v2093_v47 = vadd.f32 %v2077_v17, %v3776_v12  ;;  %v2038_v1 = vmul.f32 0.5, %v3773_v61  ;;  %v2056_v50 = vmul.f32 %v2040_v57, %v3813_v34  ;;  %v2055_v28 = vmul.f32 %v2039_v11, %v3822_v18 }
 0x6d7   : > { %v2070_v52 = vmul.f32 %v2054_v10, %v3773_v61  ;;  %2741 = vtanh.f32 %v2117_v43  ;;  %v2095_v23 = vadd.f32 %v2079_v36, %v3764_v24  ;;  %v2058_v10 = vmul.f32 %v2042_v46, %v3798_v39 }
 0x6d8   : > { %2743 = vtanh.f32 %v2116_v56  ;;  %v2110_v0 = vmul.f32 0.7978846, %v2094_v42  ;;  %v2092_v56 = vadd.f32 %v2076_v22, %v3783_v32  ;;  %v2091_v36 = vadd.f32 %v2075_v15, %v3790_v16 }
 0x6d9   : > { %v2086_v13 = vmul.f32 %v2070_v52, %v3773_v61  ;;  %v2057_v52 = vmul.f32 %v2041_v49, %v3806_v6  ;;  %v2111_v4 = vmul.f32 0.7978846, %v2095_v23  ;;  %v2074_v58 = vmul.f32 %v2058_v10, %v3798_v39 }
 0x6da   : > { %v2108_v51 = vmul.f32 0.7978846, %v2092_v56  ;;  %v2072_v3 = vmul.f32 %v2056_v50, %v3813_v34  ;;  %v2107_v49 = vmul.f32 0.7978846, %v2091_v36  ;;  %v2857_v11 = vmov 9  }
 0x6db   : > { %v2102_v63 = vadd.f32 %v2086_v13, %v3773_v61  ;;  %v2073_v9 = vmul.f32 %v2057_v52, %v3806_v6  ;;  %v2109_v61 = vmul.f32 0.7978846, %v2093_v47  ;;  %v2090_v27 = vadd.f32 %v2074_v58, %v3798_v39  ;;  %2598 = vset.pattern.permute.xlu0 %v2857_v11  ;;  %2599 = vset.pattern.permute.xlu1 %v2857_v11 }
 0x6dc   : > { %2600 = vset.pattern.permute.xlu2 %v2857_v11  ;;  %v2030_v56 = vmul.f32 0.5, %v3770_v2  ;;  %v2028_v36 = vmul.f32 0.5, %v3783_v32 }
 0x6dd   : > { %v2118_v8 = vmul.f32 0.7978846, %v2102_v63  ;;  %v2742_v45 = vpop.eup %2741  ;;  %v2089_v17 = vadd.f32 %v2073_v9, %v3806_v6  ;;  %v2106_v10 = vmul.f32 0.7978846, %v2090_v27  ;;  %v2026_v27 = vmul.f32 0.5, %v3798_v39 }
 0x6de   : > { %v2744_v48 = vpop.eup %2743  ;;  %v2149_v43 = vadd.f32 1.0, %v2742_v45  ;;  %v2088_v45 = vadd.f32 %v2072_v3, %v3813_v34 }
 0x6df   : > { %2745 = vtanh.f32 %v2118_v8  ;;  %v2148_v21 = vadd.f32 1.0, %v2744_v48  ;;  %v2105_v48 = vmul.f32 0.7978846, %v2089_v17 }
 0x6e0   : > { %2747 = vtanh.f32 %v2115_v55  ;;  %v2165_v8 = vmul.f32 %v2149_v43, %v2037_v26  ;;  %v2036_v55 = vmul.f32 0.5, %v3746_v14  ;;  %v2071_v14 = vmul.f32 %v2055_v28, %v3822_v18 }
 0x6e1   : > { %2749 = vtanh.f32 %v2114_v25  ;;  %v2035_v25 = vmul.f32 0.5, %v3748_v60  ;;  %v2104_v47 = vmul.f32 0.7978846, %v2088_v45 }
 0x6e2   : > { %2751 = vtanh.f32 %v2113_v19  ;;  %v2164_v40 = vmul.f32 %v2148_v21, %v2036_v55  ;;  %v2034_v19 = vmul.f32 0.5, %v3751_v30  ;;  %v2087_v15 = vadd.f32 %v2071_v14, %v3822_v18 }
 0x6e3   : > { %2753 = vtanh.f32 %v2112_v29  ;;  %v2033_v29 = vmul.f32 0.5, %v3755_v33  ;;  %v2032_v30 = vmul.f32 0.5, %v3760_v54  ;;  %v3855_v33 = vld [vmem:[%s3957_s8] sm:$0xff]  ;;  %v3862_v54 = vld [vmem:[%s3957_s8 + $0x8] sm:$0xff]  ;;  %v2029_v21 = vmul.f32 0.5, %v3776_v12 }
 0x6e4   : > { %2755 = vtanh.f32 %v2111_v4  ;;  %2172 = vperm.xlu0 %2598, %v3855_v33   ;;  %2176 = vperm.xlu1 %2599, %v3862_v54   ;;  %v2027_v55 = vmul.f32 0.5, %v3790_v16  ;;  %v2858_v14 = vmov 10  }
 0x6e5   : > { %v2746_v37 = vpop.eup %2745  ;;  %2757 = vtanh.f32 %v2110_v0 }
 0x6e6   : > { %v2150_v13 = vadd.f32 1.0, %v2746_v37  ;;  %v2748_v59 = vpop.eup %2747  ;;  %2759 = vtanh.f32 %v2109_v61 }
 0x6e7   : > { %v2750_v7 = vpop.eup %2749  ;;  %v2147_v5 = vadd.f32 1.0, %v2748_v59  ;;  %2761 = vtanh.f32 %v2108_v51  ;;  %v2103_v59 = vmul.f32 0.7978846, %v2087_v15 }
 0x6e8   : > { %v2166_v63 = vmul.f32 %v2150_v13, %v2038_v1  ;;  %v2752_v46 = vpop.eup %2751  ;;  %v2146_v53 = vadd.f32 1.0, %v2750_v7  ;;  %2763 = vtanh.f32 %v2107_v49  ;;  %v2031_v13 = vmul.f32 0.5, %v3764_v24  ;;  %v2781_v24 = vld [vmem:[%s3957_s8 + $0x10] sm:$0xff] }
 0x6e9   : > { %v2754_v62 = vpop.eup %2753  ;;  %v2163_v41 = vmul.f32 %v2147_v5, %v2035_v25  ;;  %v2145_v23 = vadd.f32 1.0, %v2752_v46  ;;  %2765 = vtanh.f32 %v2106_v10  ;;  %2180 = vperm.xlu2 %2600, %v2781_v24   ;;  %v2782_v46 = vld [vmem:[%s3957_s8 + $0x18] sm:$0xff]  ;;  %v2025_v25 = vmul.f32 0.5, %v3806_v6 }
 0x6ea   : > { %2187 = vmatpush.msrb.mxu2 %v2166_v63  ;;  %v2756_v57 = vpop.eup %2755  ;;  %v2162_v60 = vmul.f32 %v2146_v53, %v2034_v19  ;;  %v2144_v42 = vadd.f32 1.0, %v2754_v62  ;;  %2767 = vtanh.f32 %v2105_v48  ;;  %v2024_v62 = vmul.f32 0.5, %v3813_v34  ;;  %v2167_v34 = vld [vmem:[%s3956_s7] sm:$0xff]  ;;  %v2169_v19 = vld [vmem:[%s3956_s7 + $0x10] sm:$0xff] }
 0x6eb   : > { %v2758_v22 = vpop.eup %2757  ;;  %v2161_v52 = vmul.f32 %v2145_v23, %v2033_v29  ;;  %v2143_v37 = vadd.f32 1.0, %v2756_v57  ;;  %2769 = vtanh.f32 %v2104_v47  ;;  %v2023_v49 = vmul.f32 0.5, %v3822_v18  ;;  %v2170_v23 = vld [vmem:[%s3956_s7 + $0x18] sm:$0xff] }
 0x6ec   : > { %2188 = vmatpush.msrb.mxu2 %v2165_v8  ;;  %v2760_v4 = vpop.eup %2759  ;;  %v2160_v1 = vmul.f32 %v2144_v42, %v2032_v30  ;;  %v2142_v43 = vadd.f32 1.0, %v2758_v22  ;;  %2771 = vtanh.f32 %v2103_v59  ;;  %2184 = vperm.xlu1 %2599, %v2782_v46   ;;  %v2859_v18 = vmov 11  }
 0x6ed   : > { %v2762_v50 = vpop.eup %2761  ;;  %v2159_v0 = vmul.f32 %v2143_v37, %v2031_v13  ;;  %v2141_v58 = vadd.f32 1.0, %v2760_v4  ;;  %2602 = vset.pattern.permute.xlu0 %v2858_v14 }
 0x6ee   : > { %2189 = vmatpush.msrb.mxu2 %v2164_v40  ;;  %v2764_v63 = vpop.eup %2763  ;;  %v2158_v26 = vmul.f32 %v2142_v43, %v2030_v56  ;;  %v2140_v9 = vadd.f32 1.0, %v2762_v50  ;;  %2276 = vperm.xlu0 %2602, %v3862_v54  }
 0x6ef   : > { %v2766_v7 = vpop.eup %2765  ;;  %v2157_v61 = vmul.f32 %v2141_v58, %v2029_v21  ;;  %v2139_v2 = vadd.f32 1.0, %v2764_v63 }
 0x6f0   : > { %2190 = vmatpush.msrb.mxu2 %v2163_v41  ;;  %v2768_v28 = vpop.eup %2767  ;;  %v2156_v8 = vmul.f32 %v2140_v9, %v2028_v36  ;;  %v2138_v5 = vadd.f32 1.0, %v2766_v7  ;;  %v2168_v41 = vld [vmem:[%s3956_s7 + $0x8] sm:$0xff] }
 0x6f1   : > { %v2770_v12 = vpop.eup %2769  ;;  %v2155_v51 = vmul.f32 %v2139_v2, %v2027_v55  ;;  %v2137_v3 = vadd.f32 1.0, %v2768_v28  ;;  %2601 = vset.pattern.permute.xlu2 %v2858_v14 }
 0x6f2   : > { %2191 = vmatpush.msrb.mxu2 %v2162_v60  ;;  %v2772_v40 = vpop.eup %2771  ;;  %v2154_v32 = vmul.f32 %v2138_v5, %v2026_v27  ;;  %v2136_v53 = vadd.f32 1.0, %v2770_v12  ;;  %2272 = vperm.xlu2 %2601, %v3855_v33  }
 0x6f3   : > { %v2153_v16 = vmul.f32 %v2137_v3, %v2025_v25  ;;  %v2135_v17 = vadd.f32 1.0, %v2772_v40 }
 0x6f4   : > { %2192 = vmatpush.msrb.mxu2 %v2161_v52  ;;  %v2152_v39 = vmul.f32 %v2136_v53, %v2024_v62  ;;  %2603 = vset.pattern.permute.xlu1 %v2858_v14 }
 0x6f5   : > { %2280 = vperm.xlu1 %2603, %v2781_v24   ;;  %v2151_v6 = vmul.f32 %v2135_v17, %v2023_v49 }
 0x6f6   : > { %2193 = vmatpush.msrb.mxu2 %v2160_v1  ;;  %2606 = vset.pattern.permute.xlu0 %v2859_v18 }
 0x6f7   : > { %2300 = vperm.xlu0 %2606, %v2781_v24  }
 0x6f8   : > { %2194 = vmatpush.msrb.mxu2 %v2159_v0 }
 0x6fa   : > { %2195 = vmatpush.msrb.mxu2 %v2158_v26  ;;  %2284 = vperm.xlu2 %2601, %v2782_v46  }
 0x6fc   : > { %2196 = vmatpush.msrb.mxu2 %v2157_v61 }
 0x6fd   : > { %2604 = vset.pattern.permute.xlu1 %v2859_v18 }
 0x6fe   : > { %2197 = vmatpush.msrb.mxu2 %v2156_v8  ;;  %2292 = vperm.xlu1 %2604, %v3855_v33  }
 0x700   : > { %2198 = vmatpush.msrb.mxu2 %v2155_v51 }
 0x702   : > { %2199 = vmatpush.msrb.mxu2 %v2154_v32  ;;  %2605 = vset.pattern.permute.xlu2 %v2859_v18 }
 0x703   : > { %2296 = vperm.xlu2 %2605, %v3862_v54  }
 0x704   : > { %2200 = vmatpush.msrb.mxu2 %v2153_v16 }
 0x706   : > { %2201 = vmatpush.msrb.mxu2 %v2152_v39  ;;  %2304 = vperm.xlu1 %2604, %v2782_v46  }
 0x708   : > { %2202 = vmatpush.msrb.mxu2 %v2151_v6 }
 0x709   : > { %2203 = vmatmul.f32.vlgmr.msrb.gmra.mxu2 %v2167_v34 }
 0x711   : > { %2206 = vmatmul.f32.gmra.mxu2 %v2168_v41 }
 0x719   : > { %2209 = vmatmul.f32.gmra.mxu2 %v2169_v19 }
 0x721   : > { %2212 = vmatmul.f32.gmra.mxu2 %v2170_v23 }
 0x743   : > { %v2181_v29 = vpop.permute.xlu2 %2180 }
 0x74c   : > { %v2273_v17 = vpop.permute.xlu2 %2272 }
 0x754   : > { %v2285_v19 = vpop.permute.xlu2 %2284 }
 0x756   : > { %v2177_v45 = vpop.permute.xlu1 %2176  ;;  %v2173_v60 = vpop.permute.xlu0 %2172 }
 0x75e   : > { %v2185_v4 = vpop.permute.xlu1 %2184 }
 0x760   : > { %v2277_v34 = vpop.permute.xlu0 %2276 }
 0x767   : > { %v2281_v49 = vpop.permute.xlu1 %2280 }
 0x770   : > { %v2293_v41 = vpop.permute.xlu1 %2292 }
 0x78c   : > { %v2204_v57 = vpop.f32.mrf.mxu2 }
 0x78d   : > { %v2205_v48 = vadd.f32 %v2204_v57, %v2173_v60 }
 0x78f   : > { %v2216_v30 = vadd.f32 %v2205_v48, %v3602_v38 }
 0x791   : > { %v2220_v33 = vsel %vm430_vm1, %v2216_v30, 0.0 }
 0x794   : > { %v2207_v10 = vpop.f32.mrf.mxu2 }
 0x795   : > { %v2208_v42 = vadd.f32 %v2207_v10, %v2177_v45 }
 0x797   : > { %v2217_v52 = vadd.f32 %v2208_v42, %v3599_v35  ;;  %v2297_v42 = vpop.permute.xlu2 %2296 }
 0x799   : > { %v2221_v11 = vsel %vm430_vm1, %v2217_v52, 0.0 }
 0x79a   : > { %v2222_v43 = vadd.f32 %v2221_v11, %v2220_v33 }
 0x79c   : > { %v2210_v22 = vpop.f32.mrf.mxu2 }
 0x79d   : > { %v2211_v15 = vadd.f32 %v2210_v22, %v2181_v29 }
 0x79f   : > { %v2218_v37 = vadd.f32 %v2211_v15, %v3605_v31 }
 0x7a1   : > { %v2223_v1 = vsel %vm430_vm1, %v2218_v37, 0.0 }
 0x7a2   : > { %v2224_v50 = vadd.f32 %v2223_v1, %v2222_v43 }
 0x7a4   : > { %v2213_v47 = vpop.f32.mrf.mxu2 }
 0x7a5   : > { %v2214_v13 = vadd.f32 %v2213_v47, %v2185_v4 }
 0x7a7   : > { %v2219_v54 = vadd.f32 %v2214_v13, %v3614_v20 }
 0x7a9   : > { %v2225_v59 = vsel %vm430_vm1, %v2219_v54, 0.0 }
 0x7aa   : > { %v2226_v35 = vadd.f32 %v2225_v59, %v2224_v50 }
 0x7ac   : > { %v2227_v0 = vrot.slane %v2226_v35, 4 }
 0x7ae   : > { %v2228_v38 = vadd.f32 %v2227_v0, %v2226_v35 }
 0x7b0   : > { %v2229_v56 = vrot.slane %v2228_v38, 2 }
 0x7b2   : > { %v2230_v31 = vadd.f32 %v2229_v56, %v2228_v38 }
 0x7b4   : > { %v2231_v58 = vrot.slane %v2230_v31, 1 }
 0x7b6   : > { %v2232_v24 = vadd.f32 %v2231_v58, %v2230_v31 }
 0x7b8   : > { %v2233_v63 = vmul.f32 %v2232_v24, %v3996_v44 }
 0x7ba   : > { %v2234_v26 = vsub.f32 %v2216_v30, %v2233_v63  ;;  %v2237_v21 = vsub.f32 %v2219_v54, %v2233_v63  ;;  %v2235_v9 = vsub.f32 %v2217_v52, %v2233_v63  ;;  %v2236_v7 = vsub.f32 %v2218_v37, %v2233_v63  ;;  %v2301_v30 = vpop.permute.xlu0 %2300  ;;  %v2305_v37 = vpop.permute.xlu1 %2304 }
 0x7bc   : > { %v2238_v61 = vmul.f32 %v2234_v26, %v2234_v26  ;;  %v2239_v36 = vmul.f32 %v2235_v9, %v2235_v9  ;;  %v2240_v2 = vmul.f32 %v2236_v7, %v2236_v7  ;;  %v2241_v20 = vmul.f32 %v2237_v21, %v2237_v21 }
 0x7be   : > { %v2242_v28 = vsel %vm430_vm1, %v2238_v61, 0.0  ;;  %v2243_v8 = vsel %vm430_vm1, %v2239_v36, 0.0  ;;  %v2245_v5 = vsel %vm430_vm1, %v2240_v2, 0.0  ;;  %v2247_v12 = vsel %vm430_vm1, %v2241_v20, 0.0 }
 0x7bf   : > { %v2244_v55 = vadd.f32 %v2243_v8, %v2242_v28 }
 0x7c1   : > { %v2246_v46 = vadd.f32 %v2245_v5, %v2244_v55 }
 0x7c3   : > { %v2248_v51 = vadd.f32 %v2247_v12, %v2246_v46 }
 0x7c5   : > { %v2249_v27 = vrot.slane %v2248_v51, 4 }
 0x7c7   : > { %v2250_v3 = vadd.f32 %v2249_v27, %v2248_v51 }
 0x7c9   : > { %v2251_v40 = vrot.slane %v2250_v3, 2 }
 0x7cb   : > { %v2252_v32 = vadd.f32 %v2251_v40, %v2250_v3 }
 0x7cd   : > { %v2253_v25 = vrot.slane %v2252_v32, 1 }
 0x7cf   : > { %v2254_v53 = vadd.f32 %v2253_v25, %v2252_v32 }
 0x7d1   : > { %v2255_v16 = vmul.f32 %v2254_v53, %v3996_v44 }
 0x7d3   : > { %v2256_v62 = vadd.f32 1e-06, %v2255_v16 }
 0x7d5   : > { %2773 = vrsqrt.f32 %v2256_v62  ;;  %vm2263_vm12 = vweird.f32 %v2256_v62 }
 0x7db   : > { %v2774_v14 = vpop.eup %2773 }
 0x7dc   : > { %v2258_v39 = vmul.f32 %v2774_v14, %v2256_v62  ;;  %vm2264_vm11 = vweird.f32 %v2774_v14 }
 0x7dd   : > { %vm2265_vm13 = vmor %vm2263_vm12, %vm2264_vm11 }
 0x7de   : > { %v2259_v6 = vmul.f32 %v2774_v14, %v2258_v39 }
 0x7e0   : > { %v2260_v18 = vmul.f32 0.5, %v2259_v6 }
 0x7e2   : > { %v2261_v23 = vsub.f32 1.5, %v2260_v18 }
 0x7e4   : > { %v2262_v57 = vmul.f32 %v2774_v14, %v2261_v23 }
 0x7e6   : > { %v2266_v44 = vsel %vm2265_vm13, %v2774_v14, %v2262_v57 }
 0x7e7   : > { %v2269_v10 = vmul.f32 %v2266_v44, %v2236_v7  ;;  %v2267_v45 = vmul.f32 %v2266_v44, %v2234_v26  ;;  %v2270_v60 = vmul.f32 %v2266_v44, %v2237_v21  ;;  %v2268_v29 = vmul.f32 %v2266_v44, %v2235_v9 }
 0x7e9   : > { %v2289_v22 = vmul.f32 %v2281_v49, %v2269_v10  ;;  %v2287_v48 = vmul.f32 %v2273_v17, %v2267_v45  ;;  %v2290_v15 = vmul.f32 %v2285_v19, %v2270_v60  ;;  %v2288_v52 = vmul.f32 %v2277_v34, %v2268_v29 }
 0x7eb   : > { %v2307_v11 = vadd.f32 %v2293_v41, %v2287_v48  ;;  %v2310_v4 = vadd.f32 %v2305_v37, %v2290_v15  ;;  %v2308_v47 = vadd.f32 %v2297_v42, %v2288_v52  ;;  %v2309_v33 = vadd.f32 %v2301_v30, %v2289_v22 }
 0x7ed   : > { %2311 = vst.msk [vmem:[%s352_s29] sm:$0xff] %vm430_vm1, %v2307_v11 }
 0x7ee   : > { %2314 = vst.msk [vmem:[%s352_s29 + $0x18] sm:$0xff] %vm430_vm1, %v2310_v4 }
 0x7ef   : > { %2312 = vst.msk [vmem:[%s352_s29 + $0x8] sm:$0xff] %vm430_vm1, %v2308_v47 }
 0x7f0   : > { %2313 = vst.msk [vmem:[%s352_s29 + $0x10] sm:$0xff] %vm430_vm1, %v2309_v33 }
 0x7f1   : > { %2810 = shalt.err (!%p2807_p3)
}
 0x7f2   : > { %s2860_s20 = smov 128   ;;  %s2861_s29 = smov 8  }
 0x7f3   : > { %2519 = dma.vmem_to_hbm [thread:$0]  (%p2955_p5), %s2329_s30, 512, %s2331_s17, %s2316_s11, %s2860_s20, %s2860_s20, %s2861_s29  }
 0x7f4 PF: > { %p2525_p4 = scmp.ge.s32.totalorder %s2845_s16, 2  ;;  %s2345_s21 = sand.u32 1, %s2833_s13  }
 0x7f5   : > { %s2346_s25 = scalar_lea.sflag [#allocation3], %s2345_s21 }
 0x7f6   : > { %p2522_p7 = pnand %p2525_p4, %p2959_p6 }
 0x7f8   : > { %p2523_p8 = pneg %p2522_p7 }
 0x7fa   : > { %2828 = dma.done.wait (%p2523_p8), %s2346_s25, 512  }
 0x7fb   : > { %2830 = vsyncadd (%p2523_p8), %s2346_s25, 4294966784  ;;  %p20_p9 = scmp.ge.s32.totalorder %s2942_s19, 4   ;;  %s3997_s13 = smov %s2837_s14 }
 0x7fc   : > { %s3998_s14 = smov %s2841_s15  ;;  %s3999_s15 = smov %s2953_s22 }
 0x7fd   : > { %s4000_s16 = smov %s2942_s19  ;;  %22 = sbr.rel (!%p20_p9) target bundleno = 3 (0x3), region = 95 }
 0x802   :  { %2352 = vsyncpa [#allocation3], 1 }
 0x803   :  { %2354 = vsyncpa [#allocation3 + $0x1], 1 }

</bundles_post_ra>
